<compile_context>
chip_gen: v6e
topology: v6e:2x2x1
jax: 0.10.0
libtpu: 0.0.40
codegen_flags: <defaults>
</compile_context>

<pallas_src>
import functools

import numpy as np
import jax
import jax.numpy as jnp
from jax import lax
from jax.experimental import pallas as pl
from jax.experimental.pallas import tpu as pltpu


# ------------------------------ fused kernel ----------------------------------


def _res_cbam_kernel(x_ref, b1_ref, bi1_ref, b2_ref, bi2_ref, bsc_ref, bisc_ref,
                     wca1_ref, wca2_ref, qperm_ref, bsa_ref, esa_ref, o_ref,
                     *, H, W, CI, CO):
    f32 = jnp.float32
    x = x_ref[0]                                         # (H, W*CI) row-major NHWC rows

    def sigmoid(v):
        v = jnp.clip(v, -30.0, 30.0)
        return pl.reciprocal(1.0 + jnp.exp(-v), approx=True)

    def conv3x3(a, cin, band, bias_row):
        # a: (H, W*cin). 'same' 3x3 conv as ONE matmul against a banded weight matrix.
        zc = jnp.zeros((H, cin), f32)
        ap = jnp.concatenate([zc, a, zc], axis=1)                       # (H, (W+2)*cin)
        zr = jnp.zeros((1, (W + 2) * cin), f32)
        ap = jnp.concatenate([zr, ap, zr], axis=0)                      # (H+2, (W+2)*cin)
        rows = jnp.concatenate([ap[dy:dy + H, :] for dy in range(3)], axis=1)
        return jnp.dot(rows, band, preferred_element_type=f32) + bias_row

    # conv1 + bn1 + relu ; conv2 + bn2   (BN scale folded into the band matrices)
    out = jnp.maximum(conv3x3(x, CI, b1_ref[...], bi1_ref[...]), 0.0)   # (H, W*CO)
    out = conv3x3(out, CO, b2_ref[...], bi2_ref[...])                   # (H, W*CO)

    # shortcut: 1x1 conv + bn (block-diagonal band, BN scale folded)
    res = jnp.dot(x, bsc_ref[...], preferred_element_type=f32) + bisc_ref[...]

    # ----- channel attention ---------------------------------------------------
    srow = jnp.sum(out, axis=0, keepdims=True)           # (1, W*CO)
    mrow = jnp.max(out, axis=0, keepdims=True)           # (1, W*CO)
    width = W                                            # halving tree over the w groups
    while width > 1:
        half = width // 2
        srow = srow[:, :half * CO] + srow[:, half * CO:]
        mrow = jnp.maximum(mrow[:, :half * CO], mrow[:, half * CO:])
        width = half
    avg_c = srow * (1.0 / (H * W))                       # (1, CO)
    max_c = mrow                                         # (1, CO)

    pooled = jnp.concatenate([avg_c, max_c], axis=0)     # (2, CO)
    hid = jnp.maximum(jnp.dot(pooled, wca1_ref[...], preferred_element_type=f32), 0.0)
    z = jnp.dot(hid, wca2_ref[...], preferred_element_type=f32)
    att = sigmoid(z[0:1, :] + z[1:2, :])                 # (1, CO)
    att_row = jnp.concatenate([att] * W, axis=1)         # (1, W*CO)  (w,c)-major tiling
    y = out * att_row                                    # ca(out) * out

    # ----- spatial attention ---------------------------------------------------
    # permute rows from (w,c)-major to (c,w)-major so channel reductions are lane-aligned
    y_cw = jnp.dot(y, qperm_ref[...], preferred_element_type=f32)       # (H, CO*W)
    s = y_cw
    m = y_cw
    width = CO
    while width > 1:
        half = width // 2
        s = s[:, :half * W] + s[:, half * W:]
        m = jnp.maximum(m[:, :half * W], m[:, half * W:])
        width = half
    avg_map = s * (1.0 / CO)                             # (H, W)
    max_map = m                                          # (H, W)

    def pad3(a):                                         # (H, W) -> (H+6, W+6)
        zc = jnp.zeros((H, 3), f32)
        a = jnp.concatenate([zc, a, zc], axis=1)
        zr = jnp.zeros((3, W + 6), f32)
        return jnp.concatenate([zr, a, zr], axis=0)

    sp = jnp.concatenate([pad3(avg_map), pad3(max_map)], axis=1)        # (H+6, 2*(W+6))
    rows7 = jnp.concatenate([sp[dy:dy + H, :] for dy in range(7)], axis=1)
    sa = sigmoid(jnp.dot(rows7, bsa_ref[...], preferred_element_type=f32))   # (H, W)
    sa_row = jnp.dot(sa, esa_ref[...], preferred_element_type=f32)           # (H, W*CO)

    # sa(out)*out + shortcut, relu — single lane-dense (H, W*CO) store
    o_ref[0] = jnp.maximum(sa_row * y + res, 0.0).astype(o_ref.dtype)


# --------------------------- pallas_call wrapper -------------------------------


_OPS_ORDER = ('b1', 'bi1', 'b2', 'bi2', 'bsc', 'bisc',
              'wca1', 'wca2', 'qperm', 'bsa', 'esa')


def _full_spec(a):
    return pl.BlockSpec(a.shape, lambda n, _nd=a.ndim: (0,) * _nd)


def res_cbam_forward(x_rows, ops):
    """x_rows: (N, H, W*Cin) float32 (NHWC rows with W,C flattened). Returns (N, H, W, Cout)."""
    N, H, WCI = x_rows.shape
    W = ops['esa'].shape[0]
    CI = WCI // W
    CO = ops['wca1'].shape[0]
    assert W & (W - 1) == 0 and CO & (CO - 1) == 0, "halving trees need power-of-two W, Cout"

    kernel = functools.partial(_res_cbam_kernel, H=H, W=W, CI=CI, CO=CO)
    in_specs = [pl.BlockSpec((1, H, W * CI), lambda n: (n, 0, 0))]
    in_specs += [_full_spec(ops[k]) for k in _OPS_ORDER]

    out = pl.pallas_call(
        kernel,
        out_shape=jax.ShapeDtypeStruct((N, H, W * CO), jnp.float32),
        grid=(N,),
        in_specs=in_specs,
        out_specs=pl.BlockSpec((1, H, W * CO), lambda n: (n, 0, 0)),
        compiler_params=pltpu.CompilerParams(dimension_semantics=("parallel",)),
    )(x_rows, *(ops[k] for k in _OPS_ORDER))
    return out.reshape(N, H, W, CO)


# --------------------- host-side weight preprocessing ---------------------------


def _fold_bn(conv_bias, gamma, beta, mean, var, eps=1e-5):
    scale = gamma / jnp.sqrt(var + eps)
    bias = scale * (conv_bias - mean) + beta
    return scale, bias


def _conv3_band(w_hwio, W, sc):
    # (3,3,CI,CO) HWIO conv weight (BN scale folded) -> banded (3*(W+2)*CI, W*CO) matrix.
    kh, kw, CI, CO = w_hwio.shape
    Wp = W + 2
    w = np.asarray(w_hwio, np.float32) * np.asarray(sc, np.float32).reshape(1, 1, 1, CO)
    B = np.zeros((kh * Wp * CI, W * CO), np.float32)
    for dy in range(kh):
        for ow in range(W):
            for dx in range(kw):
                r0 = dy * Wp * CI + (ow + dx) * CI
                B[r0:r0 + CI, ow * CO:(ow + 1) * CO] = w[dy, dx]
    return jnp.asarray(B)


def _conv1_band(w_io, W, sc):
    # (CI,CO) 1x1 conv weight (BN scale folded) -> block-diagonal (W*CI, W*CO) matrix.
    CI, CO = w_io.shape
    w = np.asarray(w_io, np.float32) * np.asarray(sc, np.float32).reshape(1, CO)
    B = np.zeros((W * CI, W * CO), np.float32)
    for ow in range(W):
        B[ow * CI:(ow + 1) * CI, ow * CO:(ow + 1) * CO] = w
    return jnp.asarray(B)


def _sa_band(w_sa, W):
    # (7,7,2) spatial-attention conv weight -> banded (7*2*(W+6), W) matrix.
    kh, kw, nc = w_sa.shape
    Wp = W + 6
    w = np.asarray(w_sa, np.float32)
    B = np.zeros((kh * nc * Wp, W), np.float32)
    for dy in range(kh):
        for ch in range(nc):
            for ow in range(W):
                for dx in range(kw):
                    B[dy * nc * Wp + ch * Wp + (ow + dx), ow] = w[dy, dx, ch]
    return jnp.asarray(B)


def _perm_wc_to_cw(W, CO):
    # permutation matrix: row index w*CO+c -> column index c*W+w
    Q = np.zeros((W * CO, CO * W), np.float32)
    for w in range(W):
        for c in range(CO):
            Q[w * CO + c, c * W + w] = 1.0
    return jnp.asarray(Q)


def _expand_w_to_wc(W, CO):
    # expansion matrix: (H,W) map -> (H, W*CO) with each pixel value repeated per channel
    E = np.zeros((W, W * CO), np.float32)
    for w in range(W):
        E[w, w * CO:(w + 1) * CO] = 1.0
    return jnp.asarray(E)


def _tile_row(v, W):
    return jnp.tile(jnp.asarray(v, jnp.float32).reshape(1, -1), (1, W))


def make_params(key, cin, cout):
    ks = jax.random.split(key, 21)
    nrm = lambda k, s: 0.1 * jax.random.normal(k, s, jnp.float32)
    uni = lambda k, s: jax.random.uniform(k, s, jnp.float32, 0.5, 1.5)

    w1 = nrm(ks[0], (3, 3, cin, cout))
    sc1, bi1 = _fold_bn(nrm(ks[1], (cout,)), uni(ks[2], (cout,)), nrm(ks[3], (cout,)),
                        nrm(ks[4], (cout,)), uni(ks[5], (cout,)))
    w2 = nrm(ks[6], (3, 3, cout, cout))
    sc2, bi2 = _fold_bn(nrm(ks[7], (cout,)), uni(ks[8], (cout,)), nrm(ks[9], (cout,)),
                        nrm(ks[10], (cout,)), uni(ks[11], (cout,)))
    wsc = nrm(ks[12], (cin, cout))
    scsc, bisc = _fold_bn(nrm(ks[13], (cout,)), uni(ks[14], (cout,)), nrm(ks[15], (cout,)),
                          nrm(ks[16], (cout,)), uni(ks[17], (cout,)))
    wca1 = nrm(ks[18], (cout, cout))
    wca2 = nrm(ks[19], (cout, cout))
    wsa = nrm(ks[20], (7, 7, 2))
    return dict(w1=w1, sc1=sc1, bi1=bi1, w2=w2, sc2=sc2, bi2=bi2,
                wsc=wsc, scsc=scsc, bisc=bisc, wca1=wca1, wca2=wca2, wsa=wsa)


def make_operands(rp, W):
    CO = rp['wca1'].shape[0]
    return dict(
        b1=_conv3_band(rp['w1'], W, rp['sc1']),
        bi1=_tile_row(rp['bi1'], W),
        b2=_conv3_band(rp['w2'], W, rp['sc2']),
        bi2=_tile_row(rp['bi2'], W),
        bsc=_conv1_band(rp['wsc'], W, rp['scsc']),
        bisc=_tile_row(rp['bisc'], W),
        wca1=jnp.asarray(rp['wca1'], jnp.float32),
        wca2=jnp.asarray(rp['wca2'], jnp.float32),
        qperm=_perm_wc_to_cw(W, CO),
        bsa=_sa_band(rp['wsa'], W),
        esa=_expand_w_to_wc(W, CO),
    )


# ------------------------------ pure-JAX reference ------------------------------


def ref_forward(x_nhwc, rp):
    def conv(xi, w, pad):
        return lax.conv_general_dilated(
            xi, w, window_strides=(1, 1), padding=[(pad, pad), (pad, pad)],
            dimension_numbers=('NHWC', 'HWIO', 'NHWC'))

    out = jnp.maximum(conv(x_nhwc, rp['w1'], 1) * rp['sc1'] + rp['bi1'], 0.0)
    out = conv(out, rp['w2'], 1) * rp['sc2'] + rp['bi2']
    residual = conv(x_nhwc, rp['wsc'].reshape(1, 1, *rp['wsc'].shape), 0) * rp['scsc'] + rp['bisc']
    avg = jnp.mean(out, axis=(1, 2))
    mx = jnp.max(out, axis=(1, 2))
    mlp = lambda v: jnp.maximum(v @ rp['wca1'], 0.0) @ rp['wca2']
    att = jax.nn.sigmoid(mlp(avg) + mlp(mx))
    out = out * att[:, None, None, :]
    s = jnp.concatenate([jnp.mean(out, -1, keepdims=True),
                         jnp.max(out, -1, keepdims=True)], axis=-1)
    sa = jax.nn.sigmoid(conv(s, rp['wsa'].reshape(7, 7, 2, 1), 3))
    return jnp.maximum(sa * out + residual, 0.0)


# ------------------------------------ main ---------------------------------------


if __name__ == "__main__":
    N, CI, CO, H, W = 2, 4, 8, 16, 16
    key = jax.random.PRNGKey(0)
    kx, kp = jax.random.split(key)

    x_nchw = jax.random.normal(kx, (N, CI, H, W), jnp.float32)   # PyTorch-style input
    x_nhwc = jnp.transpose(x_nchw, (0, 2, 3, 1))                 # -> NHWC
    x_rows = x_nhwc.reshape(N, H, W * CI)                        # lane-dense rows for the kernel

    rp = make_params(kp, CI, CO)
    ops = make_operands(rp, W)

    out = jax.jit(res_cbam_forward)(x_rows, ops)
    jax.block_until_ready(out)

    ref = ref_forward(x_nhwc, rp)
    assert out.shape == (N, H, W, CO), out.shape
    if not np.allclose(np.asarray(out), np.asarray(ref), atol=3e-2, rtol=3e-2):
        raise AssertionError("Pallas output does not match pure-JAX reference")

    print("KERNEL_OK")
</pallas_src>

<mosaic_0001>
module attributes {stable_mosaic.version = 11 : i64} {
  func.func @_res_cbam_kernel(%arg0: i32, %arg1: memref<1x16x64xf32, #tpu.memory_space<vmem>>, %arg2: memref<216x128xf32, #tpu.memory_space<vmem>>, %arg3: memref<1x128xf32, #tpu.memory_space<vmem>>, %arg4: memref<432x128xf32, #tpu.memory_space<vmem>>, %arg5: memref<1x128xf32, #tpu.memory_space<vmem>>, %arg6: memref<64x128xf32, #tpu.memory_space<vmem>>, %arg7: memref<1x128xf32, #tpu.memory_space<vmem>>, %arg8: memref<8x8xf32, #tpu.memory_space<vmem>>, %arg9: memref<8x8xf32, #tpu.memory_space<vmem>>, %arg10: memref<128x128xf32, #tpu.memory_space<vmem>>, %arg11: memref<308x16xf32, #tpu.memory_space<vmem>>, %arg12: memref<16x128xf32, #tpu.memory_space<vmem>>, %arg13: memref<1x16x128xf32, #tpu.memory_space<vmem>>) attributes {dimension_semantics = [#tpu.dimension_semantics<parallel>], iteration_bounds = array<i64: 2>, scalar_prefetch = 0 : i64, scratch_operands = 0 : i64, tpu.core_type = #tpu.core_type<tc>, window_params = [{transform_indices = @transform_0, window_bounds = array<i64: 1, 16, 64>}, {pipeline_mode = #tpu.pipeline_mode<synchronous>, transform_indices = @transform_1, window_bounds = array<i64: 216, 128>}, {pipeline_mode = #tpu.pipeline_mode<synchronous>, transform_indices = @transform_2, window_bounds = array<i64: 1, 128>}, {pipeline_mode = #tpu.pipeline_mode<synchronous>, transform_indices = @transform_3, window_bounds = array<i64: 432, 128>}, {pipeline_mode = #tpu.pipeline_mode<synchronous>, transform_indices = @transform_4, window_bounds = array<i64: 1, 128>}, {pipeline_mode = #tpu.pipeline_mode<synchronous>, transform_indices = @transform_5, window_bounds = array<i64: 64, 128>}, {pipeline_mode = #tpu.pipeline_mode<synchronous>, transform_indices = @transform_6, window_bounds = array<i64: 1, 128>}, {pipeline_mode = #tpu.pipeline_mode<synchronous>, transform_indices = @transform_7, window_bounds = array<i64: 8, 8>}, {pipeline_mode = #tpu.pipeline_mode<synchronous>, transform_indices = @transform_8, window_bounds = array<i64: 8, 8>}, {pipeline_mode = #tpu.pipeline_mode<synchronous>, transform_indices = @transform_9, window_bounds = array<i64: 128, 128>}, {pipeline_mode = #tpu.pipeline_mode<synchronous>, transform_indices = @transform_10, window_bounds = array<i64: 308, 16>}, {pipeline_mode = #tpu.pipeline_mode<synchronous>, transform_indices = @transform_11, window_bounds = array<i64: 16, 128>}, {transform_indices = @transform_12, window_bounds = array<i64: 1, 16, 128>}]} {
    %c0 = arith.constant 0 : index
    %c0_0 = arith.constant 0 : index
    %c0_1 = arith.constant 0 : index
    %0 = vector.load %arg1[%c0, %c0_0, %c0_1] : memref<1x16x64xf32, #tpu.memory_space<vmem>>, vector<1x16x64xf32>
    %1 = vector.shape_cast %0 : vector<1x16x64xf32> to vector<16x64xf32>
    %c0_2 = arith.constant 0 : index
    %c0_3 = arith.constant 0 : index
    %2 = vector.load %arg2[%c0_2, %c0_3] : memref<216x128xf32, #tpu.memory_space<vmem>>, vector<216x128xf32>
    %c0_4 = arith.constant 0 : index
    %c0_5 = arith.constant 0 : index
    %3 = vector.load %arg3[%c0_4, %c0_5] : memref<1x128xf32, #tpu.memory_space<vmem>>, vector<1x128xf32>
    %cst = arith.constant 0.000000e+00 : f32
    %4 = vector.broadcast %cst : f32 to vector<16x4xf32>
    %5 = tpu.concatenate %4, %1, %4 in 1 : vector<16x4xf32>, vector<16x64xf32>, vector<16x4xf32> -> vector<16x72xf32>
    %cst_6 = arith.constant 0.000000e+00 : f32
    %6 = vector.broadcast %cst_6 : f32 to vector<1x72xf32>
    %7 = tpu.concatenate %6, %5, %6 in 0 : vector<1x72xf32>, vector<16x72xf32>, vector<1x72xf32> -> vector<18x72xf32>
    %8 = vector.extract_strided_slice %7 {offsets = [0, 0], sizes = [16, 72], strides = [1, 1]} : vector<18x72xf32> to vector<16x72xf32>
    %9 = vector.extract_strided_slice %7 {offsets = [1, 0], sizes = [16, 72], strides = [1, 1]} : vector<18x72xf32> to vector<16x72xf32>
    %10 = vector.extract_strided_slice %7 {offsets = [2, 0], sizes = [16, 72], strides = [1, 1]} : vector<18x72xf32> to vector<16x72xf32>
    %11 = tpu.concatenate %8, %9, %10 in 1 : vector<16x72xf32>, vector<16x72xf32>, vector<16x72xf32> -> vector<16x216xf32>
    %cst_7 = arith.constant dense<0.000000e+00> : vector<16x128xf32>
    %12 = tpu.matmul %11, %2, %cst_7 {dimension_numbers = #tpu.dot_dimension_numbers<[1], [0], [0], [1], [0, 0, 1, 1], [], []>} : vector<16x216xf32>, vector<216x128xf32>, vector<16x128xf32> -> vector<16x128xf32>
    %13 = vector.broadcast %3 : vector<1x128xf32> to vector<16x128xf32>
    %14 = arith.addf %12, %13 : vector<16x128xf32>
    %cst_8 = arith.constant 0.000000e+00 : f32
    %15 = vector.broadcast %cst_8 : f32 to vector<16x128xf32>
    %16 = arith.maximumf %14, %15 : vector<16x128xf32>
    %c0_9 = arith.constant 0 : index
    %c0_10 = arith.constant 0 : index
    %17 = vector.load %arg4[%c0_9, %c0_10] : memref<432x128xf32, #tpu.memory_space<vmem>>, vector<432x128xf32>
    %c0_11 = arith.constant 0 : index
    %c0_12 = arith.constant 0 : index
    %18 = vector.load %arg5[%c0_11, %c0_12] : memref<1x128xf32, #tpu.memory_space<vmem>>, vector<1x128xf32>
    %cst_13 = arith.constant 0.000000e+00 : f32
    %19 = vector.broadcast %cst_13 : f32 to vector<16x8xf32>
    %20 = tpu.concatenate %19, %16, %19 in 1 : vector<16x8xf32>, vector<16x128xf32>, vector<16x8xf32> -> vector<16x144xf32>
    %cst_14 = arith.constant 0.000000e+00 : f32
    %21 = vector.broadcast %cst_14 : f32 to vector<1x144xf32>
    %22 = tpu.concatenate %21, %20, %21 in 0 : vector<1x144xf32>, vector<16x144xf32>, vector<1x144xf32> -> vector<18x144xf32>
    %23 = vector.extract_strided_slice %22 {offsets = [0, 0], sizes = [16, 144], strides = [1, 1]} : vector<18x144xf32> to vector<16x144xf32>
    %24 = vector.extract_strided_slice %22 {offsets = [1, 0], sizes = [16, 144], strides = [1, 1]} : vector<18x144xf32> to vector<16x144xf32>
    %25 = vector.extract_strided_slice %22 {offsets = [2, 0], sizes = [16, 144], strides = [1, 1]} : vector<18x144xf32> to vector<16x144xf32>
    %26 = tpu.concatenate %23, %24, %25 in 1 : vector<16x144xf32>, vector<16x144xf32>, vector<16x144xf32> -> vector<16x432xf32>
    %cst_15 = arith.constant dense<0.000000e+00> : vector<16x128xf32>
    %27 = tpu.matmul %26, %17, %cst_15 {dimension_numbers = #tpu.dot_dimension_numbers<[1], [0], [0], [1], [0, 0, 1, 1], [], []>} : vector<16x432xf32>, vector<432x128xf32>, vector<16x128xf32> -> vector<16x128xf32>
    %28 = vector.broadcast %18 : vector<1x128xf32> to vector<16x128xf32>
    %29 = arith.addf %27, %28 : vector<16x128xf32>
    %c0_16 = arith.constant 0 : index
    %c0_17 = arith.constant 0 : index
    %30 = vector.load %arg6[%c0_16, %c0_17] : memref<64x128xf32, #tpu.memory_space<vmem>>, vector<64x128xf32>
    %cst_18 = arith.constant dense<0.000000e+00> : vector<16x128xf32>
    %31 = tpu.matmul %1, %30, %cst_18 {dimension_numbers = #tpu.dot_dimension_numbers<[1], [0], [0], [1], [0, 0, 1, 1], [], []>} : vector<16x64xf32>, vector<64x128xf32>, vector<16x128xf32> -> vector<16x128xf32>
    %c0_19 = arith.constant 0 : index
    %c0_20 = arith.constant 0 : index
    %32 = vector.load %arg7[%c0_19, %c0_20] : memref<1x128xf32, #tpu.memory_space<vmem>>, vector<1x128xf32>
    %33 = vector.broadcast %32 : vector<1x128xf32> to vector<16x128xf32>
    %34 = arith.addf %31, %33 : vector<16x128xf32>
    %cst_21 = arith.constant dense<0.000000e+00> : vector<128xf32>
    %35 = vector.multi_reduction <add>, %29, %cst_21 [0] : vector<16x128xf32> to vector<128xf32>
    %36 = vector.shape_cast %35 : vector<128xf32> to vector<1x128xf32>
    %cst_22 = arith.constant dense<0xFF800000> : vector<128xf32>
    %37 = vector.multi_reduction <maximumf>, %29, %cst_22 [0] : vector<16x128xf32> to vector<128xf32>
    %38 = vector.shape_cast %37 : vector<128xf32> to vector<1x128xf32>
    %39 = vector.extract_strided_slice %36 {offsets = [0, 0], sizes = [1, 64], strides = [1, 1]} : vector<1x128xf32> to vector<1x64xf32>
    %40 = vector.extract_strided_slice %36 {offsets = [0, 64], sizes = [1, 64], strides = [1, 1]} : vector<1x128xf32> to vector<1x64xf32>
    %41 = arith.addf %39, %40 : vector<1x64xf32>
    %42 = vector.extract_strided_slice %38 {offsets = [0, 0], sizes = [1, 64], strides = [1, 1]} : vector<1x128xf32> to vector<1x64xf32>
    %43 = vector.extract_strided_slice %38 {offsets = [0, 64], sizes = [1, 64], strides = [1, 1]} : vector<1x128xf32> to vector<1x64xf32>
    %44 = arith.maximumf %42, %43 : vector<1x64xf32>
    %45 = vector.extract_strided_slice %41 {offsets = [0, 0], sizes = [1, 32], strides = [1, 1]} : vector<1x64xf32> to vector<1x32xf32>
    %46 = vector.extract_strided_slice %41 {offsets = [0, 32], sizes = [1, 32], strides = [1, 1]} : vector<1x64xf32> to vector<1x32xf32>
    %47 = arith.addf %45, %46 : vector<1x32xf32>
    %48 = vector.extract_strided_slice %44 {offsets = [0, 0], sizes = [1, 32], strides = [1, 1]} : vector<1x64xf32> to vector<1x32xf32>
    %49 = vector.extract_strided_slice %44 {offsets = [0, 32], sizes = [1, 32], strides = [1, 1]} : vector<1x64xf32> to vector<1x32xf32>
    %50 = arith.maximumf %48, %49 : vector<1x32xf32>
    %51 = vector.extract_strided_slice %47 {offsets = [0, 0], sizes = [1, 16], strides = [1, 1]} : vector<1x32xf32> to vector<1x16xf32>
    %52 = vector.extract_strided_slice %47 {offsets = [0, 16], sizes = [1, 16], strides = [1, 1]} : vector<1x32xf32> to vector<1x16xf32>
    %53 = arith.addf %51, %52 : vector<1x16xf32>
    %54 = vector.extract_strided_slice %50 {offsets = [0, 0], sizes = [1, 16], strides = [1, 1]} : vector<1x32xf32> to vector<1x16xf32>
    %55 = vector.extract_strided_slice %50 {offsets = [0, 16], sizes = [1, 16], strides = [1, 1]} : vector<1x32xf32> to vector<1x16xf32>
    %56 = arith.maximumf %54, %55 : vector<1x16xf32>
    %57 = vector.extract_strided_slice %53 {offsets = [0, 0], sizes = [1, 8], strides = [1, 1]} : vector<1x16xf32> to vector<1x8xf32>
    %58 = vector.extract_strided_slice %53 {offsets = [0, 8], sizes = [1, 8], strides = [1, 1]} : vector<1x16xf32> to vector<1x8xf32>
    %59 = arith.addf %57, %58 : vector<1x8xf32>
    %60 = vector.extract_strided_slice %56 {offsets = [0, 0], sizes = [1, 8], strides = [1, 1]} : vector<1x16xf32> to vector<1x8xf32>
    %61 = vector.extract_strided_slice %56 {offsets = [0, 8], sizes = [1, 8], strides = [1, 1]} : vector<1x16xf32> to vector<1x8xf32>
    %62 = arith.maximumf %60, %61 : vector<1x8xf32>
    %cst_23 = arith.constant 3.906250e-03 : f32
    %63 = vector.broadcast %cst_23 : f32 to vector<1x8xf32>
    %64 = arith.mulf %59, %63 : vector<1x8xf32>
    %65 = tpu.concatenate %64, %62 in 0 : vector<1x8xf32>, vector<1x8xf32> -> vector<2x8xf32>
    %c0_24 = arith.constant 0 : index
    %c0_25 = arith.constant 0 : index
    %66 = vector.load %arg8[%c0_24, %c0_25] : memref<8x8xf32, #tpu.memory_space<vmem>>, vector<8x8xf32>
    %cst_26 = arith.constant dense<0.000000e+00> : vector<2x8xf32>
    %67 = tpu.matmul %65, %66, %cst_26 {dimension_numbers = #tpu.dot_dimension_numbers<[1], [0], [0], [1], [0, 0, 1, 1], [], []>} : vector<2x8xf32>, vector<8x8xf32>, vector<2x8xf32> -> vector<2x8xf32>
    %cst_27 = arith.constant 0.000000e+00 : f32
    %68 = vector.broadcast %cst_27 : f32 to vector<2x8xf32>
    %69 = arith.maximumf %67, %68 : vector<2x8xf32>
    %c0_28 = arith.constant 0 : index
    %c0_29 = arith.constant 0 : index
    %70 = vector.load %arg9[%c0_28, %c0_29] : memref<8x8xf32, #tpu.memory_space<vmem>>, vector<8x8xf32>
    %cst_30 = arith.constant dense<0.000000e+00> : vector<2x8xf32>
    %71 = tpu.matmul %69, %70, %cst_30 {dimension_numbers = #tpu.dot_dimension_numbers<[1], [0], [0], [1], [0, 0, 1, 1], [], []>} : vector<2x8xf32>, vector<8x8xf32>, vector<2x8xf32> -> vector<2x8xf32>
    %72 = vector.extract_strided_slice %71 {offsets = [0, 0], sizes = [1, 8], strides = [1, 1]} : vector<2x8xf32> to vector<1x8xf32>
    %73 = vector.extract_strided_slice %71 {offsets = [1, 0], sizes = [1, 8], strides = [1, 1]} : vector<2x8xf32> to vector<1x8xf32>
    %74 = arith.addf %72, %73 : vector<1x8xf32>
    %cst_31 = arith.constant -3.000000e+01 : f32
    %cst_32 = arith.constant 3.000000e+01 : f32
    %75 = vector.broadcast %cst_31 : f32 to vector<1x8xf32>
    %76 = arith.maximumf %75, %74 : vector<1x8xf32>
    %77 = vector.broadcast %cst_32 : f32 to vector<1x8xf32>
    %78 = arith.minimumf %77, %76 : vector<1x8xf32>
    %cst_33 = arith.constant 0.000000e+00 : f32
    %79 = vector.broadcast %cst_33 : f32 to vector<1x8xf32>
    %80 = arith.subf %79, %78 : vector<1x8xf32>
    %81 = math.exp %80 : vector<1x8xf32>
    %cst_34 = arith.constant 1.000000e+00 : f32
    %82 = vector.broadcast %cst_34 : f32 to vector<1x8xf32>
    %83 = arith.addf %82, %81 : vector<1x8xf32>
    %84 = tpu.reciprocal %83 {approx = true} : vector<1x8xf32> -> vector<1x8xf32>
    %85 = tpu.concatenate %84, %84, %84, %84, %84, %84, %84, %84, %84, %84, %84, %84, %84, %84, %84, %84 in 1 : vector<1x8xf32>, vector<1x8xf32>, vector<1x8xf32>, vector<1x8xf32>, vector<1x8xf32>, vector<1x8xf32>, vector<1x8xf32>, vector<1x8xf32>, vector<1x8xf32>, vector<1x8xf32>, vector<1x8xf32>, vector<1x8xf32>, vector<1x8xf32>, vector<1x8xf32>, vector<1x8xf32>, vector<1x8xf32> -> vector<1x128xf32>
    %86 = vector.broadcast %85 : vector<1x128xf32> to vector<16x128xf32>
    %87 = arith.mulf %29, %86 : vector<16x128xf32>
    %c0_35 = arith.constant 0 : index
    %c0_36 = arith.constant 0 : index
    %88 = vector.load %arg10[%c0_35, %c0_36] : memref<128x128xf32, #tpu.memory_space<vmem>>, vector<128x128xf32>
    %cst_37 = arith.constant dense<0.000000e+00> : vector<16x128xf32>
    %89 = tpu.matmul %87, %88, %cst_37 {dimension_numbers = #tpu.dot_dimension_numbers<[1], [0], [0], [1], [0, 0, 1, 1], [], []>} : vector<16x128xf32>, vector<128x128xf32>, vector<16x128xf32> -> vector<16x128xf32>
    %90 = vector.extract_strided_slice %89 {offsets = [0, 0], sizes = [16, 64], strides = [1, 1]} : vector<16x128xf32> to vector<16x64xf32>
    %91 = vector.extract_strided_slice %89 {offsets = [0, 64], sizes = [16, 64], strides = [1, 1]} : vector<16x128xf32> to vector<16x64xf32>
    %92 = arith.addf %90, %91 : vector<16x64xf32>
    %93 = vector.extract_strided_slice %89 {offsets = [0, 0], sizes = [16, 64], strides = [1, 1]} : vector<16x128xf32> to vector<16x64xf32>
    %94 = vector.extract_strided_slice %89 {offsets = [0, 64], sizes = [16, 64], strides = [1, 1]} : vector<16x128xf32> to vector<16x64xf32>
    %95 = arith.maximumf %93, %94 : vector<16x64xf32>
    %96 = vector.extract_strided_slice %92 {offsets = [0, 0], sizes = [16, 32], strides = [1, 1]} : vector<16x64xf32> to vector<16x32xf32>
    %97 = vector.extract_strided_slice %92 {offsets = [0, 32], sizes = [16, 32], strides = [1, 1]} : vector<16x64xf32> to vector<16x32xf32>
    %98 = arith.addf %96, %97 : vector<16x32xf32>
    %99 = vector.extract_strided_slice %95 {offsets = [0, 0], sizes = [16, 32], strides = [1, 1]} : vector<16x64xf32> to vector<16x32xf32>
    %100 = vector.extract_strided_slice %95 {offsets = [0, 32], sizes = [16, 32], strides = [1, 1]} : vector<16x64xf32> to vector<16x32xf32>
    %101 = arith.maximumf %99, %100 : vector<16x32xf32>
    %102 = vector.extract_strided_slice %98 {offsets = [0, 0], sizes = [16, 16], strides = [1, 1]} : vector<16x32xf32> to vector<16x16xf32>
    %103 = vector.extract_strided_slice %98 {offsets = [0, 16], sizes = [16, 16], strides = [1, 1]} : vector<16x32xf32> to vector<16x16xf32>
    %104 = arith.addf %102, %103 : vector<16x16xf32>
    %105 = vector.extract_strided_slice %101 {offsets = [0, 0], sizes = [16, 16], strides = [1, 1]} : vector<16x32xf32> to vector<16x16xf32>
    %106 = vector.extract_strided_slice %101 {offsets = [0, 16], sizes = [16, 16], strides = [1, 1]} : vector<16x32xf32> to vector<16x16xf32>
    %107 = arith.maximumf %105, %106 : vector<16x16xf32>
    %cst_38 = arith.constant 1.250000e-01 : f32
    %108 = vector.broadcast %cst_38 : f32 to vector<16x16xf32>
    %109 = arith.mulf %104, %108 : vector<16x16xf32>
    %cst_39 = arith.constant 0.000000e+00 : f32
    %110 = vector.broadcast %cst_39 : f32 to vector<16x3xf32>
    %111 = tpu.concatenate %110, %109, %110 in 1 : vector<16x3xf32>, vector<16x16xf32>, vector<16x3xf32> -> vector<16x22xf32>
    %cst_40 = arith.constant 0.000000e+00 : f32
    %112 = vector.broadcast %cst_40 : f32 to vector<3x22xf32>
    %113 = tpu.concatenate %112, %111, %112 in 0 : vector<3x22xf32>, vector<16x22xf32>, vector<3x22xf32> -> vector<22x22xf32>
    %cst_41 = arith.constant 0.000000e+00 : f32
    %114 = vector.broadcast %cst_41 : f32 to vector<16x3xf32>
    %115 = tpu.concatenate %114, %107, %114 in 1 : vector<16x3xf32>, vector<16x16xf32>, vector<16x3xf32> -> vector<16x22xf32>
    %cst_42 = arith.constant 0.000000e+00 : f32
    %116 = vector.broadcast %cst_42 : f32 to vector<3x22xf32>
    %117 = tpu.concatenate %116, %115, %116 in 0 : vector<3x22xf32>, vector<16x22xf32>, vector<3x22xf32> -> vector<22x22xf32>
    %118 = tpu.concatenate %113, %117 in 1 : vector<22x22xf32>, vector<22x22xf32> -> vector<22x44xf32>
    %119 = vector.extract_strided_slice %118 {offsets = [0, 0], sizes = [16, 44], strides = [1, 1]} : vector<22x44xf32> to vector<16x44xf32>
    %120 = vector.extract_strided_slice %118 {offsets = [1, 0], sizes = [16, 44], strides = [1, 1]} : vector<22x44xf32> to vector<16x44xf32>
    %121 = vector.extract_strided_slice %118 {offsets = [2, 0], sizes = [16, 44], strides = [1, 1]} : vector<22x44xf32> to vector<16x44xf32>
    %122 = vector.extract_strided_slice %118 {offsets = [3, 0], sizes = [16, 44], strides = [1, 1]} : vector<22x44xf32> to vector<16x44xf32>
    %123 = vector.extract_strided_slice %118 {offsets = [4, 0], sizes = [16, 44], strides = [1, 1]} : vector<22x44xf32> to vector<16x44xf32>
    %124 = vector.extract_strided_slice %118 {offsets = [5, 0], sizes = [16, 44], strides = [1, 1]} : vector<22x44xf32> to vector<16x44xf32>
    %125 = vector.extract_strided_slice %118 {offsets = [6, 0], sizes = [16, 44], strides = [1, 1]} : vector<22x44xf32> to vector<16x44xf32>
    %126 = tpu.concatenate %119, %120, %121, %122, %123, %124, %125 in 1 : vector<16x44xf32>, vector<16x44xf32>, vector<16x44xf32>, vector<16x44xf32>, vector<16x44xf32>, vector<16x44xf32>, vector<16x44xf32> -> vector<16x308xf32>
    %c0_43 = arith.constant 0 : index
    %c0_44 = arith.constant 0 : index
    %127 = vector.load %arg11[%c0_43, %c0_44] : memref<308x16xf32, #tpu.memory_space<vmem>>, vector<308x16xf32>
    %cst_45 = arith.constant dense<0.000000e+00> : vector<16x16xf32>
    %128 = tpu.matmul %126, %127, %cst_45 {dimension_numbers = #tpu.dot_dimension_numbers<[1], [0], [0], [1], [0, 0, 1, 1], [], []>} : vector<16x308xf32>, vector<308x16xf32>, vector<16x16xf32> -> vector<16x16xf32>
    %cst_46 = arith.constant -3.000000e+01 : f32
    %cst_47 = arith.constant 3.000000e+01 : f32
    %129 = vector.broadcast %cst_46 : f32 to vector<16x16xf32>
    %130 = arith.maximumf %129, %128 : vector<16x16xf32>
    %131 = vector.broadcast %cst_47 : f32 to vector<16x16xf32>
    %132 = arith.minimumf %131, %130 : vector<16x16xf32>
    %cst_48 = arith.constant 0.000000e+00 : f32
    %133 = vector.broadcast %cst_48 : f32 to vector<16x16xf32>
    %134 = arith.subf %133, %132 : vector<16x16xf32>
    %135 = math.exp %134 : vector<16x16xf32>
    %cst_49 = arith.constant 1.000000e+00 : f32
    %136 = vector.broadcast %cst_49 : f32 to vector<16x16xf32>
    %137 = arith.addf %136, %135 : vector<16x16xf32>
    %138 = tpu.reciprocal %137 {approx = true} : vector<16x16xf32> -> vector<16x16xf32>
    %c0_50 = arith.constant 0 : index
    %c0_51 = arith.constant 0 : index
    %139 = vector.load %arg12[%c0_50, %c0_51] : memref<16x128xf32, #tpu.memory_space<vmem>>, vector<16x128xf32>
    %cst_52 = arith.constant dense<0.000000e+00> : vector<16x128xf32>
    %140 = tpu.matmul %138, %139, %cst_52 {dimension_numbers = #tpu.dot_dimension_numbers<[1], [0], [0], [1], [0, 0, 1, 1], [], []>} : vector<16x16xf32>, vector<16x128xf32>, vector<16x128xf32> -> vector<16x128xf32>
    %141 = arith.mulf %140, %87 : vector<16x128xf32>
    %142 = arith.addf %141, %34 : vector<16x128xf32>
    %cst_53 = arith.constant 0.000000e+00 : f32
    %143 = vector.broadcast %cst_53 : f32 to vector<16x128xf32>
    %144 = arith.maximumf %142, %143 : vector<16x128xf32>
    %c0_54 = arith.constant 0 : index
    %c0_55 = arith.constant 0 : index
    %c0_56 = arith.constant 0 : index
    %145 = vector.load %arg13[%c0_54, %c0_55, %c0_56] : memref<1x16x128xf32, #tpu.memory_space<vmem>>, vector<1x16x128xf32>
    %146 = vector.shape_cast %145 : vector<1x16x128xf32> to vector<16x128xf32>
    %147 = vector.shape_cast %144 : vector<16x128xf32> to vector<1x16x128xf32>
    tpu.vector_store %arg13[%c0_54, %c0_55, %c0_56], %147 {strides = array<i32>} : memref<1x16x128xf32, #tpu.memory_space<vmem>>, vector<1x16x128xf32>,
    return
  }
  func.func @transform_0(%arg0: i32) -> (i32, i32, i32) {
    %c0_i32 = arith.constant 0 : i32
    %c0_i32_0 = arith.constant 0 : i32
    %c0_i32_1 = arith.constant 0 : i32
    return %arg0, %c0_i32, %c0_i32_0 : i32, i32, i32
  }
  func.func @transform_1(%arg0: i32) -> (i32, i32) {
    %c0_i32 = arith.constant 0 : i32
    %c0_i32_0 = arith.constant 0 : i32
    %c0_i32_1 = arith.constant 0 : i32
    return %c0_i32, %c0_i32_0 : i32, i32
  }
  func.func @transform_2(%arg0: i32) -> (i32, i32) {
    %c0_i32 = arith.constant 0 : i32
    %c0_i32_0 = arith.constant 0 : i32
    %c0_i32_1 = arith.constant 0 : i32
    return %c0_i32, %c0_i32_0 : i32, i32
  }
  func.func @transform_3(%arg0: i32) -> (i32, i32) {
    %c0_i32 = arith.constant 0 : i32
    %c0_i32_0 = arith.constant 0 : i32
    %c0_i32_1 = arith.constant 0 : i32
    return %c0_i32, %c0_i32_0 : i32, i32
  }
  func.func @transform_4(%arg0: i32) -> (i32, i32) {
    %c0_i32 = arith.constant 0 : i32
    %c0_i32_0 = arith.constant 0 : i32
    %c0_i32_1 = arith.constant 0 : i32
    return %c0_i32, %c0_i32_0 : i32, i32
  }
  func.func @transform_5(%arg0: i32) -> (i32, i32) {
    %c0_i32 = arith.constant 0 : i32
    %c0_i32_0 = arith.constant 0 : i32
    %c0_i32_1 = arith.constant 0 : i32
    return %c0_i32, %c0_i32_0 : i32, i32
  }
  func.func @transform_6(%arg0: i32) -> (i32, i32) {
    %c0_i32 = arith.constant 0 : i32
    %c0_i32_0 = arith.constant 0 : i32
    %c0_i32_1 = arith.constant 0 : i32
    return %c0_i32, %c0_i32_0 : i32, i32
  }
  func.func @transform_7(%arg0: i32) -> (i32, i32) {
    %c0_i32 = arith.constant 0 : i32
    %c0_i32_0 = arith.constant 0 : i32
    %c0_i32_1 = arith.constant 0 : i32
    return %c0_i32, %c0_i32_0 : i32, i32
  }
  func.func @transform_8(%arg0: i32) -> (i32, i32) {
    %c0_i32 = arith.constant 0 : i32
    %c0_i32_0 = arith.constant 0 : i32
    %c0_i32_1 = arith.constant 0 : i32
    return %c0_i32, %c0_i32_0 : i32, i32
  }
  func.func @transform_9(%arg0: i32) -> (i32, i32) {
    %c0_i32 = arith.constant 0 : i32
    %c0_i32_0 = arith.constant 0 : i32
    %c0_i32_1 = arith.constant 0 : i32
    return %c0_i32, %c0_i32_0 : i32, i32
  }
  func.func @transform_10(%arg0: i32) -> (i32, i32) {
    %c0_i32 = arith.constant 0 : i32
    %c0_i32_0 = arith.constant 0 : i32
    %c0_i32_1 = arith.constant 0 : i32
    return %c0_i32, %c0_i32_0 : i32, i32
  }
  func.func @transform_11(%arg0: i32) -> (i32, i32) {
    %c0_i32 = arith.constant 0 : i32
    %c0_i32_0 = arith.constant 0 : i32
    %c0_i32_1 = arith.constant 0 : i32
    return %c0_i32, %c0_i32_0 : i32, i32
  }
  func.func @transform_12(%arg0: i32) -> (i32, i32, i32) {
    %c0_i32 = arith.constant 0 : i32
    %c0_i32_0 = arith.constant 0 : i32
    %c0_i32_1 = arith.constant 0 : i32
    return %arg0, %c0_i32, %c0_i32_0 : i32, i32, i32
  }
}

</mosaic_0001>

<bundles_post_ra>
// kernel: res_cbam_forward.1
= control target key start
LH: loop header
LB: loop body
LE: loop exit
PB: predicated region body
PF: predicated region fallthrough
CT: control target
= control target key end

     0   :  { %s3508_s0 = inlined_call_operand.hbm [shape: f32[2,16,64], index: 0, kind: input, shape index: {}]   ;;  %s3509_s1 = inlined_call_operand.vmem [shape: f32[216,128], index: 1, kind: input, shape index: {}]   ;;  %s3510_s2 = inlined_call_operand.hbm [shape: f32[1,128], index: 2, kind: input, shape index: {}]   ;;  %s3511_s3 = inlined_call_operand.hbm [shape: f32[432,128], index: 3, kind: input, shape index: {}]   ;;  %s3512_s4 = inlined_call_operand.hbm [shape: f32[1,128], index: 4, kind: input, shape index: {}]   ;;  %s3513_s5 = inlined_call_operand.hbm [shape: f32[64,128], index: 5, kind: input, shape index: {}]   ;;  %s3514_s6 = inlined_call_operand.hbm [shape: f32[1,128], index: 6, kind: input, shape index: {}]   ;;  %s3515_s7 = inlined_call_operand.vmem [shape: f32[8,8], index: 7, kind: input, shape index: {}]   ;;  %s3516_s8 = inlined_call_operand.vmem [shape: f32[8,8], index: 8, kind: input, shape index: {}]   ;;  %s3517_s9 = inlined_call_operand.vmem [shape: f32[128,128], index: 9, kind: input, shape index: {}]   ;;  %s3518_s10 = inlined_call_operand.vmem [shape: f32[308,16], index: 10, kind: input, shape index: {}]   ;;  %s3519_s11 = inlined_call_operand.vmem [shape: f32[16,128], index: 11, kind: input, shape index: {}]   ;;  %s3520_s12 = inlined_call_operand.vmem [shape: f32[2,16,128], index: 12, kind: output, shape index: {}]  }
   0x1   :  { %3528 = sst [smem:[#allocation16_spill]] %s3510_s2 }
   0x2   :  { %3529 = sst [smem:[#allocation17_spill]] %s3511_s3 }
   0x3   :  { %17 = vsyncpa [#allocation3], 0 }
   0x4   :  { %19 = vsyncpa [#allocation3 + $0x1], 0 }
   0x5   :  { %20 = vsyncpa [#allocation5], 0 }
   0x6   :  { %21 = vsyncpa [#allocation8], 0 }
   0x7   :  { %22 = vsyncpa [#allocation11], 0  ;;  %s2788_s21 = smov 0   ;;  %s2790_s22 = smov 0  }
   0x8   :  { %s2792_s23 = smov 0   ;;  %s2794_s24 = smov 0  }
   0x9 LB: > { %s2693_s25 = smov [#allocation4]   ;;  %s2809_s27 = sadd.s32 4294967295, %s2691_s24   ;;  %s2691_s24 = sphi %s2794_s24, %s3553_s24   ;;  %s2687_s23 = sphi %s2792_s23, %s3552_s23   ;;  %s2683_s22 = sphi %s2790_s22, %s3551_s22   ;;  %s2679_s21 = sphi %s2788_s21, %s3550_s21  }
   0xa   : > { %s332_s26 = sshll.u32 %s2693_s25, 4  ;;  %p2083_p0 = scmp.ge.s32.totalorder %s2691_s24, 1  ;;  %s333_s26 = int_to_ptr.vmem [resolvable:$true] %s332_s26 }
   0xb   : > { %p3521_p1 = scmp.eq.s32.totalorder %s2809_s27, 0  ;;  %p316_p2 = scmp.lt.s32.totalorder %s2691_s24, 3 }
   0xc   : > { %s2694_s29 = smov [#allocation7]   ;;  %s2695_s13 = smov [#allocation6]  }
   0xd   : > { %p2814_p3 = pnand %p2083_p0, %p316_p2  ;;  %s356_s30 = sshll.u32 %s2694_s29, 4  ;;  %s357_s30 = int_to_ptr.vmem [resolvable:$true] %s356_s30 }
   0xe   : > { %s342_s14 = sshll.u32 %s2695_s13, 4  ;;  %s2498_s17 = scalar_lea.vmem %s333_s26, 16  ;;  %s2826_s14 = int_to_ptr.vmem [resolvable:$true] %s342_s14 }
   0xf   : > { %s3530_s28 = scalar_select %p2814_p3, 1, 0 }
  0x10   : > { %p2358_p4 = pneg %p2814_p3  ;;  %p2499_p7 = scmp.ne.s32.totalorder %s333_s26, %s2498_s17 }
  0x11   : > { %s2505_s18 = scalar_lea.vmem %s333_s26, 32  ;;  %p2506_p10 = scmp.lt.s32.totalorder %s333_s26, %s333_s26 }
  0x12   : > { %p2822_p5 = pnand %p2358_p4, %p3521_p1  ;;  %p2507_p11 = scmp.lt.s32.totalorder %s2505_s18, %s2498_s17 }
  0x14   : > { %p2830_p6 = pneg %p2822_p5  ;;  %p2508_p12 = por %p2507_p11, %p2506_p10 }
  0x16   : > { %p2501_p8 = pnand %p2499_p7, %p2830_p6 }
  0x18   : > { %p2502_p9 = pneg %p2501_p8 }
  0x1a   : > { %p2509_p13 = pnand %p2508_p12, %p2502_p9 }
  0x1c   : > { %2512 = shalt.err (!%p2509_p13)
}
  0x1d   : > { %s3533_s2 = sld [smem:[#allocation16_spill]]  ;;  %s2524_s25 = scalar_lea.vmem %s357_s30, 16 }
  0x1e   : > { %p2525_p0 = scmp.ne.s32.totalorder %s357_s30, %s2524_s25  ;;  %s2531_s29 = scalar_lea.vmem %s357_s30, 32 }
  0x1f   : > { %p2532_p7 = scmp.lt.s32.totalorder %s357_s30, %s357_s30  ;;  %p2533_p8 = scmp.lt.s32.totalorder %s2531_s29, %s2524_s25 }
  0x20   : > { %p2527_p2 = pnand %p2525_p0, %p2830_p6 }
  0x21   : > { %p2534_p1 = por %p2533_p8, %p2532_p7 }
  0x22   : > { %p2528_p4 = pneg %p2527_p2 }
  0x23   : > { %2361 = dma.hbm_to_vmem [thread:$0]  (!%p2822_p5), %s3533_s2, 16, %s333_s26, [#allocation5]  }
  0x24   : > { %p2535_p3 = pnand %p2534_p1, %p2528_p4 }
  0x26   : > { %2538 = shalt.err (!%p2535_p3)
}
  0x27   : > { %2367 = dma.hbm_to_vmem [thread:$0]  (!%p2822_p5), %s3512_s4, 16, %s357_s30, [#allocation8]  }
  0x28   : > { %s2550_s26 = scalar_lea.vmem %s2826_s14, 6912  ;;  %p2558_p12 = scmp.lt.s32.totalorder %s2826_s14, %s2826_s14 }
  0x29   : > { %p2551_p9 = scmp.ne.s32.totalorder %s2826_s14, %s2550_s26  ;;  %p2559_p13 = scmp.lt.s32.totalorder %s2550_s26, %s2550_s26 }
  0x2b   : > { %p2553_p10 = pnand %p2551_p9, %p2830_p6  ;;  %p2560_p1 = por %p2559_p13, %p2558_p12 }
  0x2d   : > { %p2554_p11 = pneg %p2553_p10 }
  0x2f   : > { %p2561_p3 = pnand %p2560_p1, %p2554_p11 }
  0x31   : > { %2564 = shalt.err (!%p2561_p3)
}
  0x32   : > { %s3523_s18 = smov 128   ;;  %s3524_s19 = smov 8  }
  0x33   : > { %s3534_s3 = sld [smem:[#allocation17_spill]]  ;;  %s2698_s25 = smov [#allocation9]  }
  0x34   : > { %s366_s29 = sshll.u32 %s2698_s25, 4  ;;  %s2699_s13 = smov [#allocation10]   ;;  %s367_s29 = int_to_ptr.vmem [resolvable:$true] %s366_s29 }
  0x35   : > { %s380_s17 = sshll.u32 %s2699_s13, 4  ;;  %s2576_s26 = scalar_lea.vmem %s367_s29, 1024  ;;  %s381_s17 = int_to_ptr.vmem [resolvable:$true] %s380_s17 }
  0x36   : > { %p2577_p0 = scmp.ne.s32.totalorder %s367_s29, %s2576_s26  ;;  %p2584_p7 = scmp.lt.s32.totalorder %s367_s29, %s367_s29 }
  0x37   : > { %p2585_p8 = scmp.lt.s32.totalorder %s2576_s26, %s2576_s26 }
  0x38   : > { %p2579_p2 = pnand %p2577_p0, %p2830_p6 }
  0x39   : > { %2364 = dma.hbm_to_vmem [thread:$0]  (!%p2822_p5), %s3534_s3, 6912, %s2826_s14, [#allocation5], %s3523_s18, %s3523_s18, %s3524_s19  }
  0x3a   : > { %p2580_p4 = pneg %p2579_p2  ;;  %p2586_p9 = por %p2585_p8, %p2584_p7 }
  0x3c   : > { %p2587_p10 = pnand %p2586_p9, %p2580_p4 }
  0x3e   : > { %2590 = shalt.err (!%p2587_p10)
}
  0x3f   : > { %2370 = dma.hbm_to_vmem [thread:$0]  (!%p2822_p5), %s3513_s5, 1024, %s367_s29, [#allocation8], %s3523_s18, %s3523_s18, %s3524_s19  }
  0x40   : > { %s2602_s20 = scalar_lea.vmem %s381_s17, 16  ;;  %s2609_s25 = scalar_lea.vmem %s381_s17, 32 }
  0x41   : > { %p2603_p11 = scmp.ne.s32.totalorder %s381_s17, %s2602_s20  ;;  %p2610_p1 = scmp.lt.s32.totalorder %s381_s17, %s381_s17 }
  0x42   : > { %p2611_p3 = scmp.lt.s32.totalorder %s2609_s25, %s2602_s20 }
  0x43   : > { %p2605_p12 = pnand %p2603_p11, %p2830_p6 }
  0x44   : > { %p2612_p0 = por %p2611_p3, %p2610_p1 }
  0x45   : > { %p2606_p13 = pneg %p2605_p12 }
  0x47   : > { %p2613_p2 = pnand %p2612_p0, %p2606_p13 }
  0x49   : > { %2616 = shalt.err (!%p2613_p2)
}
  0x4a   : > { %2373 = dma.hbm_to_vmem [thread:$0]  (!%p2822_p5), %s3514_s6, 16, %s381_s17, [#allocation11]  }
  0x4b   : > { %s2881_s16 = sadd.s32 1, %s2691_s24   ;;  %s35_s29 = sadd.s32 1, %s2687_s23 }
  0x4c   : > { %s32_s15 = ssub.s32 %s2691_s24, %s2881_s16  ;;  %p42_p4 = scmp.ne.s32.totalorder %s2687_s23, %s2683_s22 }
  0x4d   : > { %p33_p6 = scmp.eq.s32.totalorder %s32_s15, 0  ;;  %p43_p7 = scmp.eq.s32.totalorder %s2691_s24, 0 }
  0x4e   : > { %p48_p8 = scmp.ne.s32.totalorder %s2683_s22, %s2679_s21  ;;  %p3535_p10 = scmp.eq.s32.totalorder %s2809_s27, 0 }
  0x4f   : > { %s2892_s14 = scalar_select %p33_p6, %s2687_s23, %s35_s29  }
  0x50   : > { %p44_p9 = por %p43_p7, %p42_p4  ;;  %p2896_p11 = por %p3535_p10, %p48_p8 }
  0x51   : > { %p2383_p12 = scmp.lt.s32.totalorder %s2691_s24, 2  ;;  %s406_s20 = sand.u32 1, %s2687_s23  }
  0x52   : > { %s3536_s30 = scalar_select %p2896_p11, 1, 0 }
  0x53   : > { %s2090_s17 = sshll.u32 %s406_s20, 4  ;;  %s2125_s25 = sshll.u32 %s2691_s24, 8 }
  0x54   : > { %s2906_s18 = scalar_lea.hbm %s3508_s0, %s2125_s25  ;;  %s410_s21 = scalar_lea.vmem [#allocation2], %s2090_s17 }
  0x55   : > { %s417_s15 = sshll.u32 %s410_s21, 4  ;;  %p2910_p5 = pnand %p2383_p12, %p44_p9  ;;  %s2908_s15 = int_to_ptr.vmem [resolvable:$true] %s417_s15 }
  0x56   : > { %s2914_s19 = scalar_lea.sflag [#allocation3], %s406_s20  ;;  %s2617_s24 = scalar_lea.hbm %s2906_s18, 256 }
  0x57   : > { %p2618_p13 = scmp.ne.s32.totalorder %s2906_s18, %s2617_s24  ;;  %p2619_p1 = pneg %p2910_p5 }
  0x58   : > { %s2622_s17 = scalar_lea.hbm %s3508_s0, 512  ;;  %p2623_p2 = scmp.lt.s32.totalorder %s2906_s18, %s3508_s0 }
  0x59   : > { %p2620_p3 = pnand %p2619_p1, %p2618_p13  ;;  %p2624_p6 = scmp.lt.s32.totalorder %s2622_s17, %s2617_s24 }
  0x5b   : > { %p2621_p0 = pneg %p2620_p3  ;;  %p2625_p4 = por %p2624_p6, %p2623_p2 }
  0x5d   : > { %p2626_p7 = pnand %p2625_p4, %p2621_p0 }
  0x5f   : > { %2629 = shalt.err (!%p2626_p7)
}
  0x60   : > { %s2630_s20 = scalar_lea.vmem %s2908_s15, 256  ;;  %s2700_s2 = smov [#allocation2]  }
  0x61   : > { %p2631_p8 = scmp.ne.s32.totalorder %s2908_s15, %s2630_s20  ;;  %s2635_s3 = sshll.u32 %s2700_s2, 4  ;;  %s2636_s3 = int_to_ptr.vmem [resolvable:$false] %s2635_s3 }
  0x62   : > { %s2637_s25 = scalar_lea.vmem %s2636_s3, 512  ;;  %p2638_p12 = scmp.lt.s32.totalorder %s2908_s15, %s2636_s3 }
  0x63   : > { %p2633_p9 = pnand %p2631_p8, %p2619_p1  ;;  %p2639_p13 = scmp.lt.s32.totalorder %s2637_s25, %s2630_s20 }
  0x65   : > { %p2634_p10 = pneg %p2633_p9  ;;  %p2640_p3 = por %p2639_p13, %p2638_p12 }
  0x67   : > { %p2641_p11 = pnand %p2640_p3, %p2634_p10 }
  0x69   : > { %2644 = shalt.err (!%p2641_p11)
}
  0x6a   : > { %s3538_s24 = smov 8   ;;  %s3539_s13 = smov 128  }
  0x6b   : > { %2377 = dma.hbm_to_vmem [thread:$0]  (!%p2910_p5), %s2906_s18, 256, %s2908_s15, %s2914_s19, %s3539_s13, %s3539_s13, %s3538_s24  }
  0x6c   : > { %p3540_p1 = scmp.ne.s32.totalorder %s3530_s28, 0 }
  0x6d   : > { %s431_s2 = sand.u32 (!%p3540_p1), 1, %s2683_s22   ;;  %p3541_p0 = scmp.ne.s32.totalorder (!%p3540_p1), %s3536_s30, 0 }
  0x6e   : > { %429 = sbr.rel (%p3540_p1) target bundleno = 3477 (0xd95), region = 68  ;;  %s2094_s3 = sshll.u32 (!%p3540_p1), %s431_s2, 4 }
  0x6f   : > { %s432_s17 = scalar_lea.sflag (!%p3540_p1), [#allocation3], %s431_s2  ;;  %s435_s26 = scalar_lea.vmem (!%p3540_p1), [#allocation2], %s2094_s3 }
  0x73   : > { %2662 = dma.done.wait (%p3541_p0), %s432_s17, 256  }
  0x74   : > { %2664 = vsyncadd (%p3541_p0), %s432_s17, 4294967040  ;;  %p3542_p11 = scmp.eq.s32.totalorder %s2809_s27, 0 }
  0x76   : > { %2666 = dma.done.wait (%p3542_p11), [#allocation5], 6928   ;;  %p3543_p2 = pmov %p3542_p11 }
  0x78   : > { %2668 = vsyncadd (%p3543_p2), [#allocation5], 4294960368  ;;  %p3544_p5 = pmov %p3543_p2 }
  0x79   : > { %p3545_p6 = pmov %p3543_p2 }
  0x7a   : > { %2670 = dma.done.wait (%p3544_p5), [#allocation8], 1040  }
  0x7b   : > { %2672 = vsyncadd (%p3545_p6), [#allocation8], 4294966256  ;;  %p3546_p4 = pmov %p3543_p2 }
  0x7c   : > { %p3547_p7 = pmov %p3543_p2 }
  0x7d   : > { %2674 = dma.done.wait (%p3546_p4), [#allocation11], 16  }
  0x7e   : > { %2676 = vsyncadd (%p3547_p7), [#allocation11], 4294967280  ;;  %v2957_v0 = vld [vmem:[%s435_s26] sm:$0xff]  ;;  %s3526_s28 = smov 4   ;;  %v2961_v1 = vld [vmem:[%s435_s26 + $0x8] sm:$0xff]  ;;  %v2702_v3 = vmov 0.0  }
  0x7f   : > { %533 = vrot.lane.b32.xlu0 %v2957_v0, %s3526_s28  ;;  %v518_v2 = vld [vmem:[%s3509_s1 + $0x78] sm:$0xff]  ;;  %601 = vmatprep.subr.mxu0 %v2702_v3  ;;  %v517_v4 = vld [vmem:[%s3509_s1 + $0x70] sm:$0xff]  ;;  %v516_v5 = vld [vmem:[%s3509_s1 + $0x68] sm:$0xff]  ;;  %vm539_vm0 = vcmask 31744   ;;  %vm542_vm1 = vcmask 556032   ;;  %vm547_vm2 = vcmask 1040384  }
  0x80   : > { %602 = vmatpush1.msra.mxu0 %v518_v2  ;;  %v515_v6 = vld [vmem:[%s3509_s1 + $0x60] sm:$0xff]  ;;  %v514_v7 = vld [vmem:[%s3509_s1 + $0x58] sm:$0xff]  ;;  %v513_v8 = vld [vmem:[%s3509_s1 + $0x50] sm:$0xff]  ;;  %vm558_vm3 = vcmask 1046528   ;;  %s2703_s17 = smov 72   ;;  %vm570_vm4 = vcmask 1045504  }
  0x81   : > { %603 = vmatprep.subr.mxu0 %v2702_v3  ;;  %v512_v9 = vld [vmem:[%s3509_s1 + $0x48] sm:$0xff]  ;;  %v511_v10 = vld [vmem:[%s3509_s1 + $0x40] sm:$0xff]  ;;  %v510_v11 = vld [vmem:[%s3509_s1 + $0x38] sm:$0xff]  ;;  %s2704_s26 = smov 16   ;;  %vm585_vm5 = vcmask 130048   ;;  %vm594_vm6 = vcmask 719872  }
  0x82   : > { %604 = vmatpush1.msra.mxu0 %v517_v4  ;;  %v509_v12 = vld [vmem:[%s3509_s1 + $0x30] sm:$0xff]  ;;  %v508_v13 = vld [vmem:[%s3509_s1 + $0x28] sm:$0xff]  ;;  %v507_v14 = vld [vmem:[%s3509_s1 + $0x20] sm:$0xff]  ;;  %vm582_vm7 = vcmask 588800   ;;  %s2705_s18 = smov 8   ;;  %vm741_vm8 = vcmask 64512  }
  0x83   : > { %535 = vrot.lane.b32.xlu0 %v2961_v1, %s3526_s28  ;;  %605 = vmatprep.subr.mxu0 %v2702_v3  ;;  %v506_v15 = vld [vmem:[%s3509_s1 + $0x18] sm:$0xff]  ;;  %v505_v16 = vld [vmem:[%s3509_s1 + $0x10] sm:$0xff]  ;;  %v504_v17 = vld [vmem:[%s3509_s1 + $0x8] sm:$0xff]  ;;  %s2706_s19 = smov 32   ;;  %vm812_vm10 = vcmask 261120   ;;  %vm827_vm11 = vcmask 392192  }
  0x84   : > { %606 = vmatpush1.msra.mxu0 %v516_v5  ;;  %v503_v18 = vld [vmem:[%s3509_s1] sm:$0xff]  ;;  %v529_v19 = vld [vmem:[%s3509_s1 + $0xd0] sm:$0xff]  ;;  %v528_v20 = vld [vmem:[%s3509_s1 + $0xc8] sm:$0xff]  ;;  %s2707_s30 = smov 64   ;;  %s2708_s15 = smov 96   ;;  %vm997_vm12 = vcmask 523264  }
  0x85   : > { %607 = vmatprep.subr.mxu0 %v2702_v3  ;;  %v527_v21 = vld [vmem:[%s3509_s1 + $0xc0] sm:$0xff]  ;;  %v526_v22 = vld [vmem:[%s3509_s1 + $0xb8] sm:$0xff]  ;;  %v525_v23 = vld [vmem:[%s3509_s1 + $0xb0] sm:$0xff]  ;;  %s2709_s29 = smov 112   ;;  %vm2710_vm13 = vmmov 0   ;;  %s3527_s25 = smov 120  }
  0x86   : > { %608 = vmatpush1.msra.mxu0 %v515_v6  ;;  %v524_v24 = vld [vmem:[%s3509_s1 + $0xa8] sm:$0xff]  ;;  %v523_v25 = vld [vmem:[%s3509_s1 + $0xa0] sm:$0xff]  ;;  %v522_v26 = vld [vmem:[%s3509_s1 + $0x98] sm:$0xff]  ;;  %s2712_s2 = smov 24   ;;  %s2713_s24 = smov 48   ;;  %vm1344_vm14 = vcmask 195584  }
  0x87   : > { %609 = vmatprep.subr.mxu0 %v2702_v3  ;;  %v521_v27 = vld [vmem:[%s3509_s1 + $0x90] sm:$0xff]  ;;  %v520_v28 = vld [vmem:[%s3509_s1 + $0x88] sm:$0xff]  ;;  %v519_v33 = vld [vmem:[%s3509_s1 + $0x80] sm:$0xff]  ;;  %s2714_s13 = smov 40   ;;  %s2716_s20 = smov 80   ;;  %vm1347_vm15 = vcmask 326656  }
  0x88   : > { %610 = vmatpush1.msra.mxu0 %v514_v7  ;;  %v2102_v59 = vld [vmem:[#allocation4] ss:$0 sm:$0xff]  ;;  %vm2106_vm9 = vmneg %vm547_vm2  ;;  %s2717_s28 = smov 88   ;;  %s2718_s21 = smov 104  }
  0x89   : > { %611 = vmatprep.subr.mxu0 %v2702_v3  ;;  %v709_v7 = vld [vmem:[#allocation6 + $0xf8] sm:$0xff]  ;;  %s2721_s3 = smov 44   ;;  %p496_p8 = scmp.lt.s32.totalorder %s2809_s27, 1 }
  0x8a   : > { %612 = vmatpush1.msra.mxu0 %v513_v8  ;;  %v693_v8 = vld [vmem:[#allocation6 + $0x78] sm:$0xff]  ;;  %2127 = vmatprep.subr.mxu1 %v709_v7 }
  0x8b   : > { %613 = vmatprep.subr.mxu0 %v2702_v3  ;;  %2128 = vmatpush3.msra.mxu1 %v693_v8  ;;  %s3555_s27 = smov (!%p496_p8, %s2809_s27), 1 }
  0x8c   : > { %614 = vmatpush1.msra.mxu0 %v512_v9  ;;  %v708_v9 = vld [vmem:[#allocation6 + $0xf0] sm:$0xff] }
  0x8d   : > { %615 = vmatprep.subr.mxu0 %v2702_v3  ;;  %2129 = vmatprep.subr.mxu1 %v708_v9 }
  0x8e   : > { %616 = vmatpush1.msra.mxu0 %v511_v10  ;;  %v692_v10 = vld [vmem:[#allocation6 + $0x70] sm:$0xff] }
  0x8f   : > { %617 = vmatprep.subr.mxu0 %v2702_v3  ;;  %2130 = vmatpush3.msra.mxu1 %v692_v10 }
  0x90   : > { %618 = vmatpush1.msra.mxu0 %v510_v11  ;;  %v707_v11 = vld [vmem:[#allocation6 + $0xe8] sm:$0xff] }
  0x91   : > { %619 = vmatprep.subr.mxu0 %v2702_v3  ;;  %2131 = vmatprep.subr.mxu1 %v707_v11 }
  0x92   : > { %620 = vmatpush1.msra.mxu0 %v509_v12  ;;  %v691_v12 = vld [vmem:[#allocation6 + $0x68] sm:$0xff] }
  0x93   : > { %621 = vmatprep.subr.mxu0 %v2702_v3  ;;  %2132 = vmatpush3.msra.mxu1 %v691_v12 }
  0x94   : > { %622 = vmatpush1.msra.mxu0 %v508_v13  ;;  %v706_v13 = vld [vmem:[#allocation6 + $0xe0] sm:$0xff] }
  0x95   : > { %623 = vmatprep.subr.mxu0 %v2702_v3  ;;  %2133 = vmatprep.subr.mxu1 %v706_v13 }
  0x96   : > { %624 = vmatpush1.msra.mxu0 %v507_v14  ;;  %v690_v14 = vld [vmem:[#allocation6 + $0x60] sm:$0xff] }
  0x97   : > { %625 = vmatprep.subr.mxu0 %v2702_v3  ;;  %2134 = vmatpush3.msra.mxu1 %v690_v14 }
  0x98   : > { %626 = vmatpush1.msra.mxu0 %v506_v15  ;;  %v705_v15 = vld [vmem:[#allocation6 + $0xd8] sm:$0xff] }
  0x99   : > { %627 = vmatprep.subr.mxu0 %v2702_v3  ;;  %2135 = vmatprep.subr.mxu1 %v705_v15 }
  0x9a   : > { %628 = vmatpush1.msra.mxu0 %v505_v16  ;;  %v689_v16 = vld [vmem:[#allocation6 + $0x58] sm:$0xff] }
  0x9b   : > { %629 = vmatprep.subr.mxu0 %v2702_v3  ;;  %2136 = vmatpush3.msra.mxu1 %v689_v16 }
  0x9c   : > { %630 = vmatpush1.msra.mxu0 %v504_v17  ;;  %v704_v17 = vld [vmem:[#allocation6 + $0xd0] sm:$0xff] }
  0x9d   : > { %631 = vmatprep.subr.mxu0 %v2702_v3  ;;  %2137 = vmatprep.subr.mxu1 %v704_v17  ;;  %v725_v17 = vld [vmem:[#allocation6 + $0x178] sm:$0xff] }
  0x9e   : > { %632 = vmatpush1.msra.mxu0 %v503_v18  ;;  %v688_v18 = vld [vmem:[#allocation6 + $0x50] sm:$0xff] }
  0x9f   : > { %643 = vmatprep.subr.mxu0 %v2702_v3  ;;  %2138 = vmatpush3.msra.mxu1 %v688_v18 }
  0xa0   : > { %644 = vmatpush2.msra.mxu0 %v529_v19  ;;  %v703_v19 = vld [vmem:[#allocation6 + $0xc8] sm:$0xff] }
  0xa1   : > { %645 = vmatprep.subr.mxu0 %v2702_v3  ;;  %2139 = vmatprep.subr.mxu1 %v703_v19 }
  0xa2   : > { %646 = vmatpush2.msra.mxu0 %v528_v20  ;;  %v687_v20 = vld [vmem:[#allocation6 + $0x48] sm:$0xff] }
  0xa3   : > { %647 = vmatprep.subr.mxu0 %v2702_v3  ;;  %2140 = vmatpush3.msra.mxu1 %v687_v20  ;;  %v724_v20 = vld [vmem:[#allocation6 + $0x170] sm:$0xff] }
  0xa4   : > { %648 = vmatpush2.msra.mxu0 %v527_v21  ;;  %v702_v21 = vld [vmem:[#allocation6 + $0xc0] sm:$0xff] }
  0xa5   : > { %649 = vmatprep.subr.mxu0 %v2702_v3  ;;  %2141 = vmatprep.subr.mxu1 %v702_v21 }
  0xa6   : > { %650 = vmatpush2.msra.mxu0 %v526_v22  ;;  %v686_v22 = vld [vmem:[#allocation6 + $0x40] sm:$0xff] }
  0xa7   : > { %651 = vmatprep.subr.mxu0 %v2702_v3  ;;  %2142 = vmatpush3.msra.mxu1 %v686_v22  ;;  %v723_v22 = vld [vmem:[#allocation6 + $0x168] sm:$0xff] }
  0xa8   : > { %652 = vmatpush2.msra.mxu0 %v525_v23  ;;  %v701_v23 = vld [vmem:[#allocation6 + $0xb8] sm:$0xff] }
  0xa9   : > { %653 = vmatprep.subr.mxu0 %v2702_v3  ;;  %2143 = vmatprep.subr.mxu1 %v701_v23 }
  0xaa   : > { %654 = vmatpush2.msra.mxu0 %v524_v24  ;;  %v685_v24 = vld [vmem:[#allocation6 + $0x38] sm:$0xff] }
  0xab   : > { %655 = vmatprep.subr.mxu0 %v2702_v3  ;;  %2144 = vmatpush3.msra.mxu1 %v685_v24 }
  0xac   : > { %656 = vmatpush2.msra.mxu0 %v523_v25  ;;  %v700_v25 = vld [vmem:[#allocation6 + $0xb0] sm:$0xff] }
  0xad   : > { %657 = vmatprep.subr.mxu0 %v2702_v3  ;;  %2145 = vmatprep.subr.mxu1 %v700_v25 }
  0xae   : > { %658 = vmatpush2.msra.mxu0 %v522_v26  ;;  %v684_v26 = vld [vmem:[#allocation6 + $0x30] sm:$0xff] }
  0xaf   : > { %659 = vmatprep.subr.mxu0 %v2702_v3  ;;  %2146 = vmatpush3.msra.mxu1 %v684_v26  ;;  %v722_v26 = vld [vmem:[#allocation6 + $0x160] sm:$0xff] }
  0xb0   : > { %660 = vmatpush2.msra.mxu0 %v521_v27  ;;  %v699_v27 = vld [vmem:[#allocation6 + $0xa8] sm:$0xff] }
  0xb1   : > { %661 = vmatprep.subr.mxu0 %v2702_v3  ;;  %2147 = vmatprep.subr.mxu1 %v699_v27  ;;  %v721_v27 = vld [vmem:[#allocation6 + $0x158] sm:$0xff] }
  0xb2   : > { %662 = vmatpush2.msra.mxu0 %v520_v28  ;;  %v683_v28 = vld [vmem:[#allocation6 + $0x28] sm:$0xff] }
  0xb3   : > { %663 = vmatprep.subr.mxu0 %v2702_v3  ;;  %2148 = vmatpush3.msra.mxu1 %v683_v28  ;;  %v720_v28 = vld [vmem:[#allocation6 + $0x150] sm:$0xff] }
  0xb4   : > { %664 = vmatpush2.msra.mxu0 %v519_v33  ;;  %v696_v33 = vld [vmem:[#allocation6 + $0x90] sm:$0xff] }
  0xf1   : > { %v534_v29 = vpop.permute.xlu0 %533 }
  0xf2   : > { %v540_v30 = vsel %vm539_vm0, 0.0, %v534_v29  ;;  %v698_v29 = vld [vmem:[#allocation6 + $0xa0] sm:$0xff] }
  0xf3   : > { %v543_v31 = vsel %vm542_vm1, %v540_v30, 0.0  ;;  %v682_v30 = vld [vmem:[#allocation6 + $0x20] sm:$0xff]  ;;  %2149 = vmatprep.subr.mxu1 %v698_v29  ;;  %v719_v29 = vld [vmem:[#allocation6 + $0x148] sm:$0xff] }
  0xf4   : > { %v548_v32 = vrot.slane %v543_v31, 7  ;;  %v697_v31 = vld [vmem:[#allocation6 + $0x98] sm:$0xff]  ;;  %2150 = vmatpush3.msra.mxu1 %v682_v30  ;;  %v718_v30 = vld [vmem:[#allocation6 + $0x140] sm:$0xff] }
  0xf5   : > { %v536_v34 = vpop.permute.xlu0 %535  ;;  %2151 = vmatprep.subr.mxu1 %v697_v31  ;;  %v717_v31 = vld [vmem:[#allocation6 + $0x138] sm:$0xff] }
  0xf6   : > { %v541_v35 = vsel %vm539_vm0, 0.0, %v536_v34  ;;  %v554_v37 = vsel %vm547_vm2, 0.0, %v548_v32  ;;  %v680_v34 = vld [vmem:[#allocation6 + $0x10] sm:$0xff] }
  0xf7   : > { %v544_v36 = vsel %vm542_vm1, %v541_v35, 0.0  ;;  %v559_v43 = vrot.slane %v554_v37, 1  ;;  %v571_v47 = vrot.slane %v554_v37, 2  ;;  %v695_v35 = vld [vmem:[#allocation6 + $0x88] sm:$0xff]  ;;  %vm1350_vm1 = vcmask 457728  }
  0xf8   : > { %v549_v38 = vrot.slane %v544_v36, 7  ;;  %v679_v36 = vld [vmem:[#allocation6 + $0x8] sm:$0xff] }
  0xfa   : > { %v550_v39 = vsel %vm547_vm2, %v548_v32, %v549_v38  ;;  %v555_v40 = vsel %vm547_vm2, %v549_v38, 0.0  ;;  %v681_v32 = vld [vmem:[#allocation6 + $0x18] sm:$0xff]  ;;  %v678_v38 = vld [vmem:[#allocation6] sm:$0xff] }
  0xfb   : > { %v562_v41 = vrot.slane %v555_v40, 1  ;;  %v560_v42 = vrot.slane %v550_v39, 1  ;;  %v572_v46 = vrot.slane %v550_v39, 2  ;;  %v574_v48 = vrot.slane %v555_v40, 2  ;;  %2152 = vmatpush3.msra.mxu1 %v681_v32  ;;  %v716_v32 = vld [vmem:[#allocation6 + $0x130] sm:$0xff] }
  0xfc   : > { %2153 = vmatprep.subr.mxu1 %v696_v33  ;;  %v715_v33 = vld [vmem:[#allocation6 + $0x128] sm:$0xff] }
  0xfd   : > { %v563_v44 = vsel %vm558_vm3, %v560_v42, %v562_v41  ;;  %v561_v45 = vsel %vm558_vm3, %v559_v43, %v560_v42  ;;  %v573_v49 = vsel %vm570_vm4, %v571_v47, %v572_v46  ;;  %v575_v50 = vsel %vm570_vm4, %v572_v46, %v574_v48  ;;  %2154 = vmatpush3.msra.mxu1 %v680_v34  ;;  %v714_v34 = vld [vmem:[#allocation6 + $0x120] sm:$0xff] }
  0xfe   : > { %566 = vrot.lane.b32.xlu0 %v563_v44, %s2703_s17  ;;  %564 = vrot.lane.b32.xlu1 %v561_v45, %s2703_s17 }
  0xff   : > { %2155 = vmatprep.subr.mxu1 %v695_v35  ;;  %v713_v35 = vld [vmem:[#allocation6 + $0x118] sm:$0xff] }
 0x100   : > { %2156 = vmatpush3.msra.mxu1 %v679_v36  ;;  %v712_v36 = vld [vmem:[#allocation6 + $0x110] sm:$0xff] }
 0x102   : > { %576 = vrot.lane.b32.xlu1 %v573_v49, %s2704_s26 }
 0x106   : > { %578 = vrot.lane.b32.xlu1 %v575_v50, %s2704_s26 }
 0x170   : > { %v565_v51 = vpop.permute.xlu1 %564  ;;  %v567_v55 = vpop.permute.xlu0 %566 }
 0x171   : > { %v583_v54 = vsel %vm582_vm7, %v554_v37, %v565_v51  ;;  %v584_v58 = vsel %vm582_vm7, %v550_v39, %v567_v55  ;;  %v694_v37 = vld [vmem:[#allocation6 + $0x80] sm:$0xff] }
 0x172   : > { %2157 = vmatprep.subr.mxu1 %v694_v37  ;;  %v711_v37 = vld [vmem:[#allocation6 + $0x108] sm:$0xff] }
 0x173   : > { %2158 = vmatpush3.msra.mxu1 %v678_v38  ;;  %v710_v38 = vld [vmem:[#allocation6 + $0x100] sm:$0xff] }
 0x174   : > { %v577_v52 = vpop.permute.xlu1 %576  ;;  %907 = vmatprep.subr.mxu1 %v2702_v3 }
 0x175   : > { %v586_v53 = vsel %vm585_vm5, %v565_v51, %v577_v52 }
 0x176   : > { %2103 = vmatprep.mubr.msk.f32.mxu0 %vm594_vm6, %v586_v53 }
 0x177   : > { %666 = vmatmul.mubr.f32.vlgmr.msra.gmra.mxu0 %v583_v54 }
 0x178   : > { %v579_v56 = vpop.permute.xlu1 %578 }
 0x179   : > { %v587_v57 = vsel %vm585_vm5, %v567_v55, %v579_v56 }
 0x17a   : > { %2104 = vmatprep.mubr.msk.f32.mxu0 %vm594_vm6, %v587_v57 }
 0x17b   : > { %671 = vmatmul.mubr.f32.gmra.mxu0 %v584_v58 }
 0x17c   : > { %2264 = vmatprep.mubr.msk.f32.mxu0 %vm997_vm12, %v2957_v0  ;;  %v983_v0 = vld [vmem:[#allocation9 + $0x8] sm:$0xff] }
 0x237   : > { %v667_v60 = vpop.f32.mrf.mxu0 }
 0x238   : > { %v668_v61 = vadd.f32 %v2102_v59, %v667_v60 }
 0x239   : > { %v669_v62 = vpop.f32.mrf.mxu0 }
 0x23a   : > { %v676_v63 = vmax.f32 %v668_v61, 0.0 }
 0x23b   : > { %v672_v2 = vpop.f32.mrf.mxu0 }
 0x23c   : > { %v673_v4 = vadd.f32 %v2102_v59, %v672_v2  ;;  %735 = vrot.lane.b32.xlu0 %v676_v63, %s2705_s18 }
 0x23d   : > { %v674_v5 = vpop.f32.mrf.mxu0 }
 0x23e   : > { %v677_v6 = vmax.f32 %v673_v4, 0.0 }
 0x240   : > { %737 = vrot.lane.b32.xlu1 %v677_v6, %s2705_s18 }
 0x2ae   : > { %v736_v39 = vpop.permute.xlu0 %735 }
 0x2af   : > { %v742_v40 = vsel %vm741_vm8, 0.0, %v736_v39  ;;  %v744_v41 = vsel %vm741_vm8, %v736_v39, 0.0  ;;  %v731_v39 = vld [vmem:[#allocation6 + $0x1a8] sm:$0xff] }
 0x2b0   : > { %v751_v42 = vrot.slane %v744_v41, 7  ;;  %v750_v43 = vrot.slane %v742_v40, 7  ;;  %v730_v40 = vld [vmem:[#allocation6 + $0x1a0] sm:$0xff]  ;;  %v729_v41 = vld [vmem:[#allocation6 + $0x198] sm:$0xff] }
 0x2b2   : > { %v738_v44 = vpop.permute.xlu1 %737  ;;  %v763_v47 = vsel %vm547_vm2, 0.0, %v751_v42  ;;  %v762_v50 = vsel %vm547_vm2, 0.0, %v750_v43 }
 0x2b3   : > { %v743_v45 = vsel %vm741_vm8, 0.0, %v738_v44  ;;  %v745_v46 = vsel %vm741_vm8, %v738_v44, 0.0  ;;  %v773_v54 = vrot.slane %v763_v47, 1  ;;  %v770_v57 = vrot.slane %v762_v50, 1  ;;  %v728_v44 = vld [vmem:[#allocation6 + $0x190] sm:$0xff] }
 0x2b4   : > { %v752_v48 = vrot.slane %v743_v45, 7  ;;  %v754_v49 = vrot.slane %v745_v46, 7  ;;  %v794_v4 = vrot.slane %v762_v50, 2  ;;  %v797_v8 = vrot.slane %v763_v47, 2  ;;  %v727_v45 = vld [vmem:[#allocation6 + $0x188] sm:$0xff] }
 0x2b6   : > { %v753_v51 = vsel %vm547_vm2, %v750_v43, %v752_v48  ;;  %v755_v52 = vsel %vm547_vm2, %v751_v42, %v754_v49  ;;  %v764_v53 = vsel %vm547_vm2, %v752_v48, 0.0  ;;  %v765_v63 = vsel %vm547_vm2, %v754_v49, 0.0 }
 0x2b7   : > { %v774_v55 = vrot.slane %v755_v52, 1  ;;  %v776_v56 = vrot.slane %v764_v53, 1  ;;  %v771_v58 = vrot.slane %v753_v51, 1  ;;  %v795_v62 = vrot.slane %v753_v51, 2 }
 0x2b8   : > { %v798_v5 = vrot.slane %v755_v52, 2  ;;  %v778_v6 = vrot.slane %v765_v63, 1  ;;  %v800_v9 = vrot.slane %v764_v53, 2  ;;  %v802_v11 = vrot.slane %v765_v63, 2 }
 0x2b9   : > { %v775_v59 = vsel %vm558_vm3, %v773_v54, %v774_v55  ;;  %v772_v60 = vsel %vm558_vm3, %v770_v57, %v771_v58  ;;  %v777_v61 = vsel %vm558_vm3, %v771_v58, %v776_v56  ;;  %v796_v7 = vsel %vm570_vm4, %v794_v4, %v795_v62 }
 0x2ba   : > { %780 = vrot.lane.b32.xlu0 %v772_v60, %s2704_s26  ;;  %v2450_v2 = vpack.i.bf16 %v775_v59, %v777_v61  ;;  %v799_v10 = vsel %vm570_vm4, %v797_v8, %v798_v5  ;;  %v779_v12 = vsel %vm558_vm3, %v774_v55, %v778_v6  ;;  %v801_v13 = vsel %vm570_vm4, %v795_v62, %v800_v9  ;;  %v2105_v60 = vld [vmem:[#allocation7] ss:$0 sm:$0xff] }
 0x2bb   : > { %v803_v14 = vsel %vm570_vm4, %v798_v5, %v802_v11 }
 0x2bc   : > { %2451 = vrot.lane.b32.xlu1 %v2450_v2, %s2704_s26 }
 0x2be   : > { %804 = vrot.lane.b32.xlu0 %v796_v7, %s2706_s19 }
 0x2c0   : > { %806 = vrot.lane.b32.xlu1 %v799_v10, %s2706_s19 }
 0x2c2   : > { %786 = vrot.lane.b32.xlu0 %v779_v12, %s2704_s26 }
 0x2c4   : > { %808 = vrot.lane.b32.xlu1 %v801_v13, %s2706_s19 }
 0x2c6   : > { %810 = vrot.lane.b32.xlu0 %v803_v14, %s2706_s19 }
 0x32c   : > { %v3122_v15 = vpop.permute.xlu0 %780 }
 0x32d   : > { %v817_v16 = vsel %vm585_vm5, %v763_v47, %v3122_v15  ;;  %v726_v47 = vld [vmem:[#allocation6 + $0x180] sm:$0xff] }
 0x32e   : > { %v3127_v18 = vpop.permute.xlu1 %2451  ;;  %896 = vmatprep.mubr.f32.mxu1 %v817_v16 }
 0x32f   : > { %v2453_v19 = vunpack.i.l.bf16 %v3127_v18  ;;  %2107 = vmatmul.mubr.msk.f32.vlgmr.msra.gmra.mxu1 %vm2106_vm9, %v750_v43  ;;  %v2454_v43 = vunpack.i.h.bf16 %v3127_v18  ;;  %vm1357_vm9 = vcmask 785408  }
 0x330   : > { %908 = vmatpush1.msra.mxu1 %v725_v17  ;;  %v3134_v23 = vpop.permute.xlu0 %804 }
 0x331   : > { %909 = vmatprep.subr.mxu1 %v2702_v3  ;;  %v818_v21 = vsel %vm585_vm5, %v755_v52, %v2453_v19  ;;  %v788_v46 = vsel %vm585_vm5, %v3122_v15, %v2454_v43 }
 0x332   : > { %910 = vmatpush1.msra.mxu1 %v724_v20  ;;  %v807_v24 = vpop.permute.xlu1 %806  ;;  %901 = vmatprep.mubr.f32.mxu1 %v818_v21  ;;  %v819_v49 = vsel %vm812_vm10, %v788_v46, %v3134_v23 }
 0x333   : > { %v813_v25 = vsel %vm812_vm10, %v3134_v23, %v807_v24  ;;  %911 = vmatprep.subr.mxu1 %v2702_v3  ;;  %902 = vmatmul.mubr.f32.gmra.mxu1 %v753_v51 }
 0x334   : > { %912 = vmatpush1.msra.mxu1 %v723_v22  ;;  %2108 = vmatprep.mubr.msk.f32.mxu1 %vm827_vm11, %v813_v25  ;;  %v787_v42 = vpop.permute.xlu0 %786 }
 0x335   : > { %913 = vmatprep.subr.mxu1 %v2702_v3  ;;  %v789_v51 = vsel %vm585_vm5, %v2453_v19, %v787_v42 }
 0x336   : > { %914 = vmatpush1.msra.mxu1 %v722_v26  ;;  %v809_v50 = vpop.permute.xlu1 %808  ;;  %v989_v26 = vld [vmem:[#allocation9 + $0x38] sm:$0xff] }
 0x337   : > { %915 = vmatprep.subr.mxu1 %v2702_v3  ;;  %v820_v53 = vsel %vm812_vm10, %v789_v51, %v809_v50  ;;  %2248 = vmatprep.subr.mxu0 %v989_v26 }
 0x338   : > { %916 = vmatpush1.msra.mxu1 %v721_v27  ;;  %v811_v48 = vpop.permute.xlu0 %810  ;;  %v988_v27 = vld [vmem:[#allocation9 + $0x30] sm:$0xff]  ;;  %2249 = vmatpush3.msra.mxu0 %v989_v26 }
 0x339   : > { %917 = vmatprep.subr.mxu1 %v2702_v3  ;;  %v814_v52 = vsel %vm812_vm10, %v809_v50, %v811_v48  ;;  %2250 = vmatprep.subr.mxu0 %v988_v27 }
 0x33a   : > { %918 = vmatpush1.msra.mxu1 %v720_v28  ;;  %v987_v28 = vld [vmem:[#allocation9 + $0x28] sm:$0xff]  ;;  %2251 = vmatpush3.msra.mxu0 %v988_v27 }
 0x33b   : > { %919 = vmatprep.subr.mxu1 %v2702_v3  ;;  %2252 = vmatprep.subr.mxu0 %v987_v28 }
 0x33c   : > { %920 = vmatpush1.msra.mxu1 %v719_v29  ;;  %v986_v29 = vld [vmem:[#allocation9 + $0x20] sm:$0xff]  ;;  %2253 = vmatpush3.msra.mxu0 %v987_v28 }
 0x33d   : > { %921 = vmatprep.subr.mxu1 %v2702_v3  ;;  %2254 = vmatprep.subr.mxu0 %v986_v29 }
 0x33e   : > { %922 = vmatpush1.msra.mxu1 %v718_v30  ;;  %v985_v30 = vld [vmem:[#allocation9 + $0x18] sm:$0xff]  ;;  %2255 = vmatpush3.msra.mxu0 %v986_v29 }
 0x33f   : > { %923 = vmatprep.subr.mxu1 %v2702_v3  ;;  %2256 = vmatprep.subr.mxu0 %v985_v30 }
 0x340   : > { %924 = vmatpush1.msra.mxu1 %v717_v31  ;;  %2257 = vmatpush3.msra.mxu0 %v985_v30 }
 0x341   : > { %925 = vmatprep.subr.mxu1 %v2702_v3 }
 0x342   : > { %926 = vmatpush1.msra.mxu1 %v716_v32 }
 0x343   : > { %927 = vmatprep.subr.mxu1 %v2702_v3 }
 0x344   : > { %928 = vmatpush1.msra.mxu1 %v715_v33 }
 0x345   : > { %929 = vmatprep.subr.mxu1 %v2702_v3 }
 0x346   : > { %930 = vmatpush1.msra.mxu1 %v714_v34 }
 0x347   : > { %931 = vmatprep.subr.mxu1 %v2702_v3 }
 0x348   : > { %932 = vmatpush1.msra.mxu1 %v713_v35  ;;  %v984_v35 = vld [vmem:[#allocation9 + $0x10] sm:$0xff] }
 0x349   : > { %933 = vmatprep.subr.mxu1 %v2702_v3  ;;  %2258 = vmatprep.subr.mxu0 %v984_v35 }
 0x34a   : > { %934 = vmatpush1.msra.mxu1 %v712_v36  ;;  %2259 = vmatpush3.msra.mxu0 %v984_v35  ;;  %v982_v36 = vld [vmem:[#allocation9] sm:$0xff] }
 0x34b   : > { %935 = vmatprep.subr.mxu1 %v2702_v3  ;;  %2260 = vmatprep.subr.mxu0 %v983_v0 }
 0x34c   : > { %936 = vmatpush1.msra.mxu1 %v711_v37  ;;  %2261 = vmatpush3.msra.mxu0 %v983_v0  ;;  %v1136_v37 = vld [vmem:[%s3515_s7] sm:$0xff] }
 0x34d   : > { %937 = vmatprep.subr.mxu1 %v2702_v3  ;;  %2262 = vmatprep.subr.mxu0 %v982_v36 }
 0x34e   : > { %938 = vmatpush1.msra.mxu1 %v710_v38  ;;  %2263 = vmatpush3.msra.mxu0 %v982_v36 }
 0x34f   : > { %959 = vmatprep.subr.mxu1 %v2702_v3  ;;  %2265 = vmatmul.mubr.msk.f32.vlgmr.msra.gmra.mxu0 %vm997_vm12, %v2961_v1 }
 0x350   : > { %960 = vmatpush2.msra.mxu1 %v731_v39  ;;  %2267 = vmatprep.subr.mxu0 %v2702_v3 }
 0x351   : > { %961 = vmatprep.subr.mxu1 %v2702_v3  ;;  %2268 = vmatpush3.msra.mxu0 %v1136_v37 }
 0x352   : > { %962 = vmatpush2.msra.mxu1 %v730_v40  ;;  %2269 = vmatprep.mubr.msk.f32.mxu0 %vm2710_vm13, %v2702_v3 }
 0x353   : > { %963 = vmatprep.subr.mxu1 %v2702_v3  ;;  %2272 = vmatprep.subr.mxu0 %v2702_v3 }
 0x354   : > { %964 = vmatpush2.msra.mxu1 %v729_v41 }
 0x355   : > { %965 = vmatprep.subr.mxu1 %v2702_v3 }
 0x356   : > { %966 = vmatpush2.msra.mxu1 %v728_v44 }
 0x357   : > { %967 = vmatprep.subr.mxu1 %v2702_v3 }
 0x358   : > { %968 = vmatpush2.msra.mxu1 %v727_v45 }
 0x359   : > { %969 = vmatprep.subr.mxu1 %v2702_v3 }
 0x35a   : > { %970 = vmatpush2.msra.mxu1 %v726_v47  ;;  %v1211_v47 = vld [vmem:[%s3516_s8] sm:$0xff] }
 0x35b   : > { %972 = vmatmul.mubr.f32.vlgmr.msra.gmra.mxu1 %v819_v49 }
 0x35c   : > { %2109 = vmatprep.mubr.msk.f32.mxu1 %vm827_vm11, %v814_v52 }
 0x35f   : > { %977 = vmatmul.mubr.f32.gmra.mxu1 %v820_v53 }
 0x3ef   : > { %v2159_v54 = vpop.f32.mrf.mxu1 }
 0x3f1   : > { %v2160_v55 = vpop.f32.mrf.mxu1 }
 0x3f2   : > { %v2161_v58 = vadd.f32 %v2160_v55, %v2159_v54 }
 0x3f3   : > { %v2162_v56 = vpop.f32.mrf.mxu1 }
 0x3f4   : > { %v899_v63 = vadd.f32 %v2161_v58, %v2105_v60 }
 0x3f5   : > { %v2163_v57 = vpop.f32.mrf.mxu1 }
 0x3f6   : > { %v2164_v59 = vadd.f32 %v2163_v57, %v2162_v56 }
 0x3f8   : > { %v904_v2 = vadd.f32 %v2164_v59, %v2105_v60 }
 0x40f   : > { %v3204_v49 = vpop.f32.mrf.mxu0 }
 0x411   : > { %v3206_v50 = vpop.f32.mrf.mxu0 }
 0x41b   : > { %v973_v61 = vpop.f32.mrf.mxu1 }
 0x41c   : > { %v3170_v5 = vadd.f32 %v973_v61, %v899_v63  ;;  %v1385_v63 = vld [vmem:[%s3517_s9 + $0x70] sm:$0xff] }
 0x41d   : > { %v975_v62 = vpop.f32.mrf.mxu1 }
 0x41f   : > { %v978_v4 = vpop.f32.mrf.mxu1 }
 0x420   : > { %v3172_v6 = vadd.f32 %v978_v4, %v904_v2  ;;  %v1384_v2 = vld [vmem:[%s3517_s9 + $0x68] sm:$0xff]  ;;  %v1383_v4 = vld [vmem:[%s3517_s9 + $0x60] sm:$0xff] }
 0x421   : > { %v980_v7 = vpop.f32.mrf.mxu1 }
 0x422   : > { %v1077_v8 = vadd.f32 %v3172_v6, %v3170_v5  ;;  %v1084_v9 = vmax.f32 %v3170_v5, %v3172_v6  ;;  %v1382_v7 = vld [vmem:[%s3517_s9 + $0x58] sm:$0xff] }
 0x424   : > { %v1078_v10 = vrot.slane %v1077_v8, 4  ;;  %v1085_v11 = vrot.slane %v1084_v9, 4 }
 0x426   : > { %v1079_v12 = vadd.f32 %v1078_v10, %v1077_v8  ;;  %v1086_v13 = vmax.f32 %v1084_v9, %v1085_v11  ;;  %v1381_v8 = vld [vmem:[%s3517_s9 + $0x50] sm:$0xff]  ;;  %v1380_v10 = vld [vmem:[%s3517_s9 + $0x48] sm:$0xff]  ;;  %v1379_v11 = vld [vmem:[%s3517_s9 + $0x40] sm:$0xff] }
 0x428   : > { %v1087_v14 = vrot.slane %v1086_v13, 2  ;;  %v1080_v15 = vrot.slane %v1079_v12, 2 }
 0x42a   : > { %v1088_v16 = vmax.f32 %v1086_v13, %v1087_v14  ;;  %v1081_v17 = vadd.f32 %v1080_v15, %v1079_v12  ;;  %v1378_v12 = vld [vmem:[%s3517_s9 + $0x38] sm:$0xff]  ;;  %v1377_v13 = vld [vmem:[%s3517_s9 + $0x30] sm:$0xff]  ;;  %v1376_v14 = vld [vmem:[%s3517_s9 + $0x28] sm:$0xff] }
 0x42b   : > { %v1375_v15 = vld [vmem:[%s3517_s9 + $0x20] sm:$0xff] }
 0x42c   : > { %v1089_v18 = vrot.slane %v1088_v16, 1  ;;  %v1082_v19 = vrot.slane %v1081_v17, 1 }
 0x42e   : > { %v1090_v20 = vmax.f32 %v1088_v16, %v1089_v18  ;;  %v1083_v21 = vadd.f32 %v1082_v19, %v1081_v17  ;;  %v1374_v16 = vld [vmem:[%s3517_s9 + $0x18] sm:$0xff]  ;;  %v1373_v17 = vld [vmem:[%s3517_s9 + $0x10] sm:$0xff]  ;;  %v1372_v18 = vld [vmem:[%s3517_s9 + $0x8] sm:$0xff] }
 0x42f   : > { %v1371_v19 = vld [vmem:[%s3517_s9] sm:$0xff] }
 0x430   : > { %1097 = vrot.lane.b32.xlu0 %v1090_v20, %s2707_s30  ;;  %1092 = vrot.lane.b32.xlu1 %v1083_v21, %s2707_s30 }
 0x4a2   : > { %v1098_v22 = vpop.permute.xlu0 %1097  ;;  %v1093_v23 = vpop.permute.xlu1 %1092 }
 0x4a3   : > { %v1100_v24 = vmax.f32 %v1090_v20, %v1098_v22  ;;  %v1095_v25 = vadd.f32 %v1093_v23, %v1083_v21 }
 0x4a5   : > { %1107 = vrot.lane.b32.xlu0 %v1100_v24, %s2708_s15  ;;  %1102 = vrot.lane.b32.xlu1 %v1095_v25, %s2708_s15 }
 0x517   : > { %v1108_v31 = vpop.permute.xlu0 %1107  ;;  %v1103_v32 = vpop.permute.xlu1 %1102 }
 0x518   : > { %v1110_v33 = vmax.f32 %v1100_v24, %v1108_v31  ;;  %v1105_v34 = vadd.f32 %v1103_v32, %v1095_v25 }
 0x51a   : > { %1117 = vrot.lane.b32.xlu0 %v1110_v33, %s2709_s29  ;;  %1112 = vrot.lane.b32.xlu1 %v1105_v34, %s2709_s29 }
 0x58c   : > { %v1118_v38 = vpop.permute.xlu0 %1117  ;;  %v1113_v39 = vpop.permute.xlu1 %1112 }
 0x58d   : > { %v1120_v40 = vmax.f32 %v1110_v33, %v1118_v38  ;;  %v1115_v41 = vadd.f32 %v1113_v39, %v1105_v34  ;;  %v1365_v38 = vlaneseq }
 0x58f   : > { %1127 = vrot.lane.b32.xlu0 %v1120_v40, %s3527_s25  ;;  %1122 = vrot.lane.b32.xlu1 %v1115_v41, %s3527_s25  ;;  %s2715_s25 = smov 56  }
 0x601   : > { %v1128_v1 = vpop.permute.xlu0 %1127  ;;  %v1123_v42 = vpop.permute.xlu1 %1122 }
 0x602   : > { %v1130_v43 = vmax.f32 %v1120_v40, %v1128_v1  ;;  %v1125_v44 = vadd.f32 %v1123_v42, %v1115_v41  ;;  %v1366_v42 = vshrl.u32 %v1365_v38, 7 }
 0x604   : > { %v1133_v45 = vrot.slane %v1130_v43, 7  ;;  %v1131_v46 = vmul.f32 0.00390625, %v1125_v44 }
 0x606   : > { %v1135_v48 = vsel %vm547_vm2, %v1131_v46, %v1133_v45  ;;  %vm1354_vm2 = vcmask 654336  }
 0x607   : > { %2270 = vmatmul.mubr.msk.f32.vlgmr.msra.gmra.mxu0 %vm741_vm8, %v1135_v48 }
 0x608   : > { %2273 = vmatpush3.msra.mxu0 %v1211_v47  ;;  %2274 = vmatprep.mubr.msk.f32.mxu0 %vm2710_vm13, %v2702_v3  ;;  %v1386_v3 = vld [vmem:[%s3517_s9 + $0x78] sm:$0xff]  ;;  %vm1361_vm13 = vcmask 916480   ;;  %v1367_v47 = vsub.s32 0, %v1366_v42  ;;  %v1692_v42 = vld [vmem:[%s3518_s10 + $0xe8] sm:$0xff] }
 0x609   : > { %2277 = vmatprep.subr.mxu1 %v1386_v3 }
 0x60a   : > { %2278 = vmatpush3.msra.mxu1 %v1386_v3 }
 0x60b   : > { %2279 = vmatprep.subr.mxu1 %v1385_v63 }
 0x60c   : > { %2280 = vmatpush3.msra.mxu1 %v1385_v63 }
 0x60d   : > { %2281 = vmatprep.subr.mxu1 %v1384_v2 }
 0x60e   : > { %2282 = vmatpush3.msra.mxu1 %v1384_v2 }
 0x60f   : > { %2283 = vmatprep.subr.mxu1 %v1383_v4 }
 0x610   : > { %2284 = vmatpush3.msra.mxu1 %v1383_v4 }
 0x611   : > { %2285 = vmatprep.subr.mxu1 %v1382_v7 }
 0x612   : > { %2286 = vmatpush3.msra.mxu1 %v1382_v7 }
 0x613   : > { %2287 = vmatprep.subr.mxu1 %v1381_v8 }
 0x614   : > { %2288 = vmatpush3.msra.mxu1 %v1381_v8 }
 0x615   : > { %2289 = vmatprep.subr.mxu1 %v1380_v10 }
 0x616   : > { %2290 = vmatpush3.msra.mxu1 %v1380_v10 }
 0x617   : > { %2291 = vmatprep.subr.mxu1 %v1379_v11 }
 0x618   : > { %2292 = vmatpush3.msra.mxu1 %v1379_v11 }
 0x619   : > { %2293 = vmatprep.subr.mxu1 %v1378_v12 }
 0x61a   : > { %2294 = vmatpush3.msra.mxu1 %v1378_v12 }
 0x61b   : > { %2295 = vmatprep.subr.mxu1 %v1377_v13 }
 0x61c   : > { %2296 = vmatpush3.msra.mxu1 %v1377_v13 }
 0x61d   : > { %2297 = vmatprep.subr.mxu1 %v1376_v14 }
 0x61e   : > { %2298 = vmatpush3.msra.mxu1 %v1376_v14 }
 0x61f   : > { %2299 = vmatprep.subr.mxu1 %v1375_v15 }
 0x620   : > { %2300 = vmatpush3.msra.mxu1 %v1375_v15 }
 0x621   : > { %2301 = vmatprep.subr.mxu1 %v1374_v16 }
 0x622   : > { %2302 = vmatpush3.msra.mxu1 %v1374_v16 }
 0x623   : > { %2303 = vmatprep.subr.mxu1 %v1373_v17 }
 0x624   : > { %2304 = vmatpush3.msra.mxu1 %v1373_v17 }
 0x625   : > { %2305 = vmatprep.subr.mxu1 %v1372_v18 }
 0x626   : > { %2306 = vmatpush3.msra.mxu1 %v1372_v18 }
 0x627   : > { %2307 = vmatprep.subr.mxu1 %v1371_v19 }
 0x628   : > { %2308 = vmatpush3.msra.mxu1 %v1371_v19 }
 0x6c7   : > { %v1206_v51 = vpop.f32.mrf.mxu0 }
 0x6c8   : > { %v1210_v52 = vmax.f32 %v1206_v51, 0.0 }
 0x6c9   : > { %v2271_v53 = vpop.f32.mrf.mxu0 }
 0x6ca   : > { %2275 = vmatmul.mubr.msk.f32.vlgmr.msra.gmra.mxu0 %vm741_vm8, %v1210_v52 }
 0x78a   : > { %v1281_v54 = vpop.f32.mrf.mxu0 }
 0x78b   : > { %v1286_v55 = vrot.slane %v1281_v54, 1 }
 0x78c   : > { %v2276_v56 = vpop.f32.mrf.mxu0 }
 0x78d   : > { %v1288_v57 = vadd.f32 %v1286_v55, %v1281_v54 }
 0x78f   : > { %v2115_v58 = vclamps-f32 %v1288_v57, 30.0 }
 0x791   : > { %v1291_v59 = vsub.f32 0.0, %v2115_v58 }
 0x793   : > { %v1292_v60 = vmul.f32 1.442695, %v1291_v59 }
 0x795   : > { %2475 = vpow2.f32 %v1292_v60 }
 0x7a2   : > { %v2476_v61 = vpop.eup %2475 }
 0x7a3   : > { %v1294_v62 = vadd.f32 1.0, %v2476_v61 }
 0x7a5   : > { %2477 = vrcp.f32 %v1294_v62 }
 0x7b2   : > { %v2478_v9 = vpop.eup %2477 }
 0x7b3   : > { %1300 = vrot.lane.b32.xlu0 %v2478_v9, %s2704_s26  ;;  %1297 = vrot.lane.b32.xlu1 %v2478_v9, %s2705_s18  ;;  %s3548_s26 = smov 120  }
 0x7b7   : > { %1306 = vrot.lane.b32.xlu0 %v2478_v9, %s2706_s19  ;;  %1303 = vrot.lane.b32.xlu1 %v2478_v9, %s2712_s2 }
 0x7bb   : > { %1312 = vrot.lane.b32.xlu0 %v2478_v9, %s2713_s24  ;;  %1309 = vrot.lane.b32.xlu1 %v2478_v9, %s2714_s13 }
 0x7bf   : > { %1318 = vrot.lane.b32.xlu0 %v2478_v9, %s2707_s30  ;;  %1315 = vrot.lane.b32.xlu1 %v2478_v9, %s2715_s25 }
 0x7c3   : > { %1324 = vrot.lane.b32.xlu0 %v2478_v9, %s2716_s20  ;;  %1321 = vrot.lane.b32.xlu1 %v2478_v9, %s2703_s17  ;;  %s3549_s17 = smov 4  }
 0x7c7   : > { %1330 = vrot.lane.b32.xlu0 %v2478_v9, %s2708_s15  ;;  %1327 = vrot.lane.b32.xlu1 %v2478_v9, %s2717_s28 }
 0x7cb   : > { %1336 = vrot.lane.b32.xlu0 %v2478_v9, %s2709_s29  ;;  %1333 = vrot.lane.b32.xlu1 %v2478_v9, %s2718_s21 }
 0x7cf   : > { %1339 = vrot.lane.b32.xlu1 %v2478_v9, %s3548_s26 }
 0x825   : > { %v1301_v20 = vpop.permute.xlu0 %1300  ;;  %v1298_v21 = vpop.permute.xlu1 %1297 }
 0x826   : > { %v1342_v22 = vsel %vm741_vm8, %v2478_v9, %v1298_v21 }
 0x827   : > { %v1343_v24 = vsel %vm585_vm5, %v1342_v22, %v1301_v20 }
 0x829   : > { %v1307_v23 = vpop.permute.xlu0 %1306  ;;  %v1304_v25 = vpop.permute.xlu1 %1303 }
 0x82a   : > { %v1345_v26 = vsel %vm1344_vm14, %v1343_v24, %v1304_v25  ;;  %vm1363_vm14 = vcmask 982016  }
 0x82b   : > { %v1346_v28 = vsel %vm812_vm10, %v1345_v26, %v1307_v23  ;;  %vm1359_vm10 = vcmask 850944  }
 0x82d   : > { %v1313_v27 = vpop.permute.xlu0 %1312  ;;  %v1310_v29 = vpop.permute.xlu1 %1309 }
 0x82e   : > { %v1348_v30 = vsel %vm1347_vm15, %v1346_v28, %v1310_v29  ;;  %vm1532_vm15 = vcmask 1042432  }
 0x82f   : > { %v1349_v32 = vsel %vm827_vm11, %v1348_v30, %v1313_v27 }
 0x831   : > { %v1319_v31 = vpop.permute.xlu0 %1318  ;;  %v1316_v33 = vpop.permute.xlu1 %1315 }
 0x832   : > { %v1351_v34 = vsel %vm1350_vm1, %v1349_v32, %v1316_v33  ;;  %vm1573_vm1 = vcmask 179200  }
 0x833   : > { %v1352_v0 = vsel %vm997_vm12, %v1351_v34, %v1319_v31  ;;  %vm1527_vm12 = vcmask 154624  }
 0x835   : > { %v1325_v35 = vpop.permute.xlu0 %1324  ;;  %v1322_v36 = vpop.permute.xlu1 %1321 }
 0x836   : > { %v1353_v37 = vsel %vm582_vm7, %v1352_v0, %v1322_v36  ;;  %vm1524_vm7 = vcmask 23552  }
 0x837   : > { %v1355_v40 = vsel %vm1354_vm2, %v1353_v37, %v1325_v35  ;;  %vm1614_vm2 = vcmask 1043456  }
 0x839   : > { %v1331_v39 = vpop.permute.xlu0 %1330  ;;  %v1328_v41 = vpop.permute.xlu1 %1327 }
 0x83a   : > { %v1356_v1 = vsel %vm594_vm6, %v1355_v40, %v1328_v41  ;;  %v1678_v40 = vld [vmem:[%s3518_s10 + $0x78] sm:$0xff]  ;;  %v1693_v41 = vld [vmem:[%s3518_s10 + $0xf0] sm:$0xff] }
 0x83b   : > { %v1358_v43 = vsel %vm1357_vm9, %v1356_v1, %v1331_v39  ;;  %v1694_v39 = vld [vmem:[%s3518_s10 + $0xf8] sm:$0xff]  ;;  %v1677_v1 = vld [vmem:[%s3518_s10 + $0x70] sm:$0xff]  ;;  %vm1602_vm9 = vcmask 1044480  }
 0x83c   : > { %2197 = vmatprep.subr.mxu0 %v1694_v39 }
 0x83d   : > { %v1334_v44 = vpop.permute.xlu1 %1333  ;;  %v1337_v45 = vpop.permute.xlu0 %1336  ;;  %2198 = vmatpush3.msra.mxu0 %v1678_v40  ;;  %v1696_v40 = vld [vmem:[%s3518_s10 + $0x108] sm:$0xff] }
 0x83e   : > { %v1360_v46 = vsel %vm1359_vm10, %v1358_v43, %v1334_v44  ;;  %2199 = vmatprep.subr.mxu0 %v1693_v41  ;;  %v1676_v43 = vld [vmem:[%s3518_s10 + $0x68] sm:$0xff]  ;;  %v1691_v44 = vld [vmem:[%s3518_s10 + $0xe0] sm:$0xff]  ;;  %vm1658_vm10 = vcmask 752640  }
 0x83f   : > { %v1362_v48 = vsel %vm1361_vm13, %v1360_v46, %v1337_v45  ;;  %2200 = vmatpush3.msra.mxu0 %v1677_v1  ;;  %v1675_v45 = vld [vmem:[%s3518_s10 + $0x60] sm:$0xff]  ;;  %v1690_v46 = vld [vmem:[%s3518_s10 + $0xd8] sm:$0xff]  ;;  %vm1702_vm13 = vcmask 424960  }
 0x840   : > { %2201 = vmatprep.subr.mxu0 %v1692_v42 }
 0x841   : > { %v1340_v51 = vpop.permute.xlu1 %1339  ;;  %2202 = vmatpush3.msra.mxu0 %v1676_v43 }
 0x842   : > { %v1364_v52 = vsel %vm1363_vm14, %v1362_v48, %v1340_v51  ;;  %2203 = vmatprep.subr.mxu0 %v1691_v44  ;;  %v1689_v48 = vld [vmem:[%s3518_s10 + $0xd0] sm:$0xff]  ;;  %v1695_v44 = vld [vmem:[%s3518_s10 + $0x100] sm:$0xff] }
 0x843   : > { %v1368_v53 = vrot.slane %v1364_v52, %v1367_v47  ;;  %v1674_v47 = vld [vmem:[%s3518_s10 + $0x58] sm:$0xff]  ;;  %2204 = vmatpush3.msra.mxu0 %v1675_v45  ;;  %v1673_v51 = vld [vmem:[%s3518_s10 + $0x50] sm:$0xff]  ;;  %v1688_v52 = vld [vmem:[%s3518_s10 + $0xc8] sm:$0xff] }
 0x844   : > { %2205 = vmatprep.subr.mxu0 %v1690_v46 }
 0x845   : > { %v3275_v54 = vmul.f32 %v1368_v53, %v3172_v6  ;;  %v3278_v55 = vmul.f32 %v1368_v53, %v3170_v5  ;;  %2206 = vmatpush3.msra.mxu0 %v1674_v47  ;;  %v1672_v53 = vld [vmem:[%s3518_s10 + $0x48] sm:$0xff] }
 0x846   : > { %2207 = vmatprep.subr.mxu0 %v1689_v48 }
 0x847   : > { %2309 = vmatprep.mubr.f32.mxu1 %v3278_v55  ;;  %2208 = vmatpush3.msra.mxu0 %v1673_v51 }
 0x848   : > { %2310 = vmatmul.mubr.f32.vlgmr.msra.gmra.mxu1 %v3275_v54  ;;  %2209 = vmatprep.subr.mxu0 %v1688_v52 }
 0x849   : > { %2210 = vmatpush3.msra.mxu0 %v1672_v53 }
 0x908   : > { %v2311_v56 = vpop.f32.mrf.mxu1 }
 0x909   : > { %1466 = vrot.lane.b32.xlu1 %v2311_v56, %s2707_s30 }
 0x90a   : > { %v1453_v57 = vpop.f32.mrf.mxu1 }
 0x90b   : > { %1464 = vrot.lane.b32.xlu0 %v1453_v57, %s2707_s30  ;;  %s2719_s30 = smov 3  }
 0x97b   : > { %v1467_v58 = vpop.permute.xlu1 %1466 }
 0x97c   : > { %v1473_v59 = vmax.f32 %v2311_v56, %v1467_v58  ;;  %v1471_v6 = vadd.f32 %v2311_v56, %v1467_v58  ;;  %v1687_v56 = vld [vmem:[%s3518_s10 + $0xc0] sm:$0xff]  ;;  %v1686_v58 = vld [vmem:[%s3518_s10 + $0xb8] sm:$0xff] }
 0x97d   : > { %v1465_v60 = vpop.permute.xlu0 %1464  ;;  %2211 = vmatprep.subr.mxu0 %v1687_v56 }
 0x97e   : > { %v1472_v61 = vmax.f32 %v1453_v57, %v1465_v60  ;;  %1488 = vrot.lane.b32.xlu1 %v1473_v59, %s2708_s15  ;;  %v1470_v5 = vadd.f32 %v1465_v60, %v1453_v57  ;;  %v1671_v57 = vld [vmem:[%s3518_s10 + $0x40] sm:$0xff]  ;;  %v1685_v60 = vld [vmem:[%s3518_s10 + $0xb0] sm:$0xff] }
 0x97f   : > { %2212 = vmatpush3.msra.mxu0 %v1671_v57 }
 0x980   : > { %1486 = vrot.lane.b32.xlu0 %v1472_v61, %s2708_s15  ;;  %2213 = vmatprep.subr.mxu0 %v1686_v58 }
 0x982   : > { %1478 = vrot.lane.b32.xlu1 %v1471_v6, %s2708_s15 }
 0x984   : > { %1476 = vrot.lane.b32.xlu0 %v1470_v5, %s2708_s15  ;;  %s2720_s15 = smov 22  }
 0x9f0   : > { %v1489_v62 = vpop.permute.xlu1 %1488 }
 0x9f1   : > { %v1493_v3 = vmax.f32 %v1473_v59, %v1489_v62  ;;  %v1670_v59 = vld [vmem:[%s3518_s10 + $0x38] sm:$0xff]  ;;  %v1683_v62 = vld [vmem:[%s3518_s10 + $0xa0] sm:$0xff] }
 0x9f2   : > { %v1487_v63 = vpop.permute.xlu0 %1486  ;;  %2214 = vmatpush3.msra.mxu0 %v1670_v59 }
 0x9f3   : > { %v1492_v2 = vmax.f32 %v1472_v61, %v1487_v63  ;;  %1508 = vrot.lane.b32.xlu1 %v1493_v3, %s2709_s29  ;;  %v1669_v61 = vld [vmem:[%s3518_s10 + $0x30] sm:$0xff]  ;;  %2215 = vmatprep.subr.mxu0 %v1685_v60  ;;  %v1667_v63 = vld [vmem:[%s3518_s10 + $0x20] sm:$0xff] }
 0x9f4   : > { %v1479_v4 = vpop.permute.xlu1 %1478  ;;  %2216 = vmatpush3.msra.mxu0 %v1669_v61 }
 0x9f5   : > { %v1483_v7 = vadd.f32 %v1479_v4, %v1471_v6  ;;  %1506 = vrot.lane.b32.xlu0 %v1492_v2, %s2709_s29  ;;  %v1684_v6 = vld [vmem:[%s3518_s10 + $0xa8] sm:$0xff] }
 0x9f6   : > { %v1477_v8 = vpop.permute.xlu0 %1476  ;;  %2217 = vmatprep.subr.mxu0 %v1684_v6  ;;  %v1700_v4 = vld [vmem:[%s3518_s10 + $0x128] sm:$0xff] }
 0x9f7   : > { %v1482_v9 = vadd.f32 %v1477_v8, %v1470_v5  ;;  %1498 = vrot.lane.b32.xlu1 %v1483_v7, %s2709_s29  ;;  %v1668_v5 = vld [vmem:[%s3518_s10 + $0x28] sm:$0xff] }
 0x9f8   : > { %2218 = vmatpush3.msra.mxu0 %v1668_v5 }
 0x9f9   : > { %1496 = vrot.lane.b32.xlu0 %v1482_v9, %s2709_s29  ;;  %2219 = vmatprep.subr.mxu0 %v1683_v62 }
 0x9fa   : > { %2220 = vmatpush3.msra.mxu0 %v1667_v63 }
 0xa65   : > { %v1509_v10 = vpop.permute.xlu1 %1508 }
 0xa66   : > { %v1513_v11 = vmax.f32 %v1493_v3, %v1509_v10  ;;  %v1701_v3 = vld [vmem:[%s3518_s10 + $0x130] sm:$0xf] }
 0xa67   : > { %v1507_v12 = vpop.permute.xlu0 %1506  ;;  %2312 = vmatprep.subr.msk.mxu1 %vm1614_vm2, %v1701_v3 }
 0xa68   : > { %v1512_v13 = vmax.f32 %v1492_v2, %v1507_v12  ;;  %1545 = vrot.lane.b32.xlu1 %v1513_v11, %s2719_s30  ;;  %v1682_v2 = vld [vmem:[%s3518_s10 + $0x98] sm:$0xff]  ;;  %2313 = vmatpush3.msk.msra.mxu1 %vm1614_vm2, %v1701_v3 }
 0xa69   : > { %v1499_v14 = vpop.permute.xlu1 %1498  ;;  %2221 = vmatprep.subr.mxu0 %v1682_v2  ;;  %2314 = vmatprep.subr.mxu1 %v1700_v4 }
 0xa6a   : > { %v1503_v15 = vadd.f32 %v1499_v14, %v1483_v7  ;;  %1543 = vrot.lane.b32.xlu0 %v1512_v13, %s2719_s30  ;;  %v1666_v7 = vld [vmem:[%s3518_s10 + $0x18] sm:$0xff]  ;;  %2315 = vmatpush3.msra.mxu1 %v1700_v4  ;;  %v1681_v13 = vld [vmem:[%s3518_s10 + $0x90] sm:$0xff]  ;;  %v1699_v14 = vld [vmem:[%s3518_s10 + $0x120] sm:$0xff] }
 0xa6b   : > { %v1497_v16 = vpop.permute.xlu0 %1496  ;;  %2222 = vmatpush3.msra.mxu0 %v1666_v7  ;;  %2316 = vmatprep.subr.mxu1 %v1699_v14 }
 0xa6c   : > { %v1515_v17 = vmul.f32 0.125, %v1503_v15  ;;  %v1502_v18 = vadd.f32 %v1497_v16, %v1482_v9  ;;  %2223 = vmatprep.subr.mxu0 %v1681_v13  ;;  %v1665_v16 = vld [vmem:[%s3518_s10 + $0x10] sm:$0xff]  ;;  %2317 = vmatpush3.msra.mxu1 %v1699_v14 }
 0xa6d   : > { %2224 = vmatpush3.msra.mxu0 %v1665_v16 }
 0xa6e   : > { %v1514_v19 = vmul.f32 0.125, %v1502_v18  ;;  %1520 = vrot.lane.b32.xlu1 %v1515_v17, %s2719_s30  ;;  %v1680_v17 = vld [vmem:[%s3518_s10 + $0x88] sm:$0xff] }
 0xa6f   : > { %2225 = vmatprep.subr.mxu0 %v1680_v17 }
 0xa70   : > { %1518 = vrot.lane.b32.xlu0 %v1514_v19, %s2719_s30  ;;  %s2126_s30 = sshll.u32 %s3555_s27, 4 }
 0xa71   : > { %s500_s20 = scalar_lea.vmem %s3520_s12, %s2126_s30 }
 0xada   : > { %v1546_v20 = vpop.permute.xlu1 %1545 }
 0xadb   : > { %v1550_v21 = vsel %vm1524_vm7, 0.0, %v1546_v20 }
 0xadc   : > { %v1552_v22 = vsel %vm1527_vm12, %v1550_v21, 0.0  ;;  %v1544_v23 = vpop.permute.xlu0 %1543 }
 0xadd   : > { %v1549_v24 = vsel %vm1524_vm7, 0.0, %v1544_v23  ;;  %v1556_v26 = vrot.slane %v1552_v22, 5  ;;  %v1698_v23 = vld [vmem:[%s3518_s10 + $0x118] sm:$0xff] }
 0xade   : > { %v1551_v25 = vsel %vm1527_vm12, %v1549_v24, 0.0  ;;  %v1664_v24 = vld [vmem:[%s3518_s10 + $0x8] sm:$0xff]  ;;  %2318 = vmatprep.subr.mxu1 %v1698_v23 }
 0xadf   : > { %v1555_v27 = vrot.slane %v1551_v25, 5  ;;  %v1561_v37 = vsel %vm1532_vm15, %v1556_v26, 0.0  ;;  %2226 = vmatpush3.msra.mxu0 %v1664_v24  ;;  %2319 = vmatpush3.msra.mxu1 %v1698_v23 }
 0xae0   : > { %v1521_v28 = vpop.permute.xlu1 %1520 }
 0xae1   : > { %v1526_v29 = vsel %vm1524_vm7, 0.0, %v1521_v28  ;;  %v1560_v30 = vsel %vm1532_vm15, 0.0, %v1555_v27  ;;  %v1557_v31 = vsel %vm1532_vm15, %v1555_v27, %v1556_v26  ;;  %v1679_v26 = vld [vmem:[%s3518_s10 + $0x80] sm:$0xff]  ;;  %v1697_v27 = vld [vmem:[%s3518_s10 + $0x110] sm:$0xff] }
 0xae2   : > { %v3300_v32 = vsel %vm1527_vm12, %v1526_v29, 0.0  ;;  %1564 = vrot.lane.b32.xlu0 %v1560_v30, %s2720_s15  ;;  %1566 = vrot.lane.b32.xlu1 %v1557_v31, %s2720_s15  ;;  %v1519_v33 = vpop.permute.xlu0 %1518  ;;  %v1663_v28 = vld [vmem:[%s3518_s10] sm:$0xff] }
 0xae3   : > { %v1525_v34 = vsel %vm1524_vm7, 0.0, %v1519_v33  ;;  %v1534_v0 = vrot.slane %v3300_v32, 5  ;;  %2227 = vmatprep.subr.mxu0 %v1679_v26  ;;  %2320 = vmatprep.subr.mxu1 %v1697_v27 }
 0xae4   : > { %v1528_v35 = vsel %vm1527_vm12, %v1525_v34, 0.0  ;;  %2228 = vmatpush3.msra.mxu0 %v1663_v28  ;;  %2321 = vmatpush3.msra.mxu1 %v1697_v27 }
 0xae5   : > { %v1533_v36 = vrot.slane %v1528_v35, 5  ;;  %v1540_v15 = vsel %vm1532_vm15, %v1534_v0, 0.0  ;;  %2322 = vmatprep.subr.mxu1 %v1696_v40 }
 0xae6   : > { %1568 = vrot.lane.b32.xlu0 %v1561_v37, %s2720_s15  ;;  %2323 = vmatpush3.msra.mxu1 %v1696_v40 }
 0xae7   : > { %v1535_v38 = vsel %vm1532_vm15, %v1533_v36, %v1534_v0  ;;  %v1539_v8 = vsel %vm1532_vm15, 0.0, %v1533_v36  ;;  %2324 = vmatprep.subr.mxu1 %v1695_v44 }
 0xae8   : > { %2325 = vmatpush3.msra.mxu1 %v1695_v44 }
 0xb54   : > { %v1567_v9 = vpop.permute.xlu1 %1566  ;;  %v1565_v10 = vpop.permute.xlu0 %1564 }
 0xb55   : > { %v3397_v11 = vsel %vm1573_vm1, %v1535_v38, %v1567_v9  ;;  %v3400_v12 = vsel %vm1573_vm1, %v1539_v8, %v1565_v10 }
 0xb56   : > { %v1603_v19 = vrot.slane %v3400_v12, 3  ;;  %v1604_v20 = vrot.slane %v3397_v11, 3  ;;  %v1591_v21 = vrot.slane %v3400_v12, 2  ;;  %v1592_v22 = vrot.slane %v3397_v11, 2 }
 0xb57   : > { %v1615_v33 = vrot.slane %v3400_v12, 4  ;;  %v1616_v34 = vrot.slane %v3397_v11, 4  ;;  %v1580_v35 = vrot.slane %v3400_v12, 1  ;;  %v1581_v0 = vrot.slane %v3397_v11, 1 }
 0xb58   : > { %v1569_v18 = vpop.permute.xlu0 %1568  ;;  %v1605_v36 = vsel %vm1602_vm9, %v1603_v19, %v1604_v20  ;;  %v1593_v38 = vsel %vm570_vm4, %v1591_v21, %v1592_v22  ;;  %v1626_v51 = vrot.slane %v3400_v12, 5  ;;  %v1627_v52 = vrot.slane %v3397_v11, 5 }
 0xb59   : > { %v1576_v25 = vsel %vm1573_vm1, %v1540_v15, %v1569_v18  ;;  %v1617_v45 = vsel %vm1614_vm2, %v1615_v33, %v1616_v34  ;;  %v1582_v46 = vsel %vm558_vm3, %v1580_v35, %v1581_v0  ;;  %v1638_v56 = vrot.slane %v3400_v12, 6 }
 0xb5a   : > { %v1606_v29 = vrot.slane %v1576_v25, 3  ;;  %v1594_v30 = vrot.slane %v1576_v25, 2  ;;  %v1618_v31 = vrot.slane %v1576_v25, 4  ;;  %v1583_v32 = vrot.slane %v1576_v25, 1 }
 0xb5b   : > { %v1629_v53 = vrot.slane %v1576_v25, 5  ;;  %v1628_v57 = vsel %vm1532_vm15, %v1626_v51, %v1627_v52  ;;  %v1639_v59 = vrot.slane %v3397_v11, 6  ;;  %v1641_v60 = vrot.slane %v1576_v25, 6 }
 0xb5c   : > { %v1607_v37 = vsel %vm1602_vm9, %v1604_v20, %v1606_v29  ;;  %v1595_v39 = vsel %vm570_vm4, %v1592_v22, %v1594_v30  ;;  %v1619_v42 = vsel %vm1614_vm2, %v1616_v34, %v1618_v31  ;;  %v1584_v43 = vsel %vm558_vm3, %v1581_v0, %v1583_v32  ;;  %v1877_v30 = vld [vmem:[%s3519_s11 + $0x8] sm:$0xff] }
 0xb5d   : > { %v2460_v41 = vpack.i.bf16 %v1607_v37, %v1605_v36  ;;  %v2455_v1 = vpack.i.bf16 %v1595_v39, %v1593_v38  ;;  %v2465_v47 = vpack.i.bf16 %v1619_v42, %v1617_v45  ;;  %v2470_v48 = vpack.i.bf16 %v1584_v43, %v1582_v46  ;;  %2329 = vmatprep.subr.mxu0 %v1877_v30 }
 0xb5e   : > { %v1630_v58 = vsel %vm1532_vm15, %v1627_v52, %v1629_v53  ;;  %vm1637_vm3 = vcmask 1041408   ;;  %vm1649_vm4 = vcmask 359424   ;;  %v2110_v53 = vld [vmem:[#allocation10] ss:$0 sm:$0xff] }
 0xb5f   : > { %2461 = vrot.lane.b32.xlu0 %v2460_v41, %s3549_s17  ;;  %2456 = vrot.lane.b32.xlu1 %v2455_v1, %s2717_s28  ;;  %s2722_s28 = smov 92   ;;  %v1640_v61 = vsel %vm1637_vm3, %v1638_v56, %v1639_v59  ;;  %v1642_v6 = vsel %vm1637_vm3, %v1639_v59, %v1641_v60  ;;  %v1069_v60 = vadd.f32 %v2110_v53, %v3206_v50 }
 0xb63   : > { %2466 = vrot.lane.b32.xlu1 %v2465_v47, %s2713_s24  ;;  %2471 = vrot.lane.b32.xlu0 %v2470_v48, %s2721_s3 }
 0xb67   : > { %1631 = vrot.lane.b32.xlu1 %v1628_v57, %s2722_s28  ;;  %1633 = vrot.lane.b32.xlu0 %v1630_v58, %s2722_s28  ;;  %v1074_v57 = vadd.f32 %v3204_v49, %v2110_v53 }
 0xb6b   : > { %1643 = vrot.lane.b32.xlu1 %v1640_v61, %s2705_s18  ;;  %1645 = vrot.lane.b32.xlu0 %v1642_v6, %s2705_s18 }
 0xbd1   : > { %v2462_v5 = vpop.permute.xlu0 %2461  ;;  %v2457_v62 = vpop.permute.xlu1 %2456 }
 0xbd2   : > { %v2463_v3 = vunpack.i.l.bf16 %v2462_v5  ;;  %v2458_v63 = vunpack.i.l.bf16 %v2457_v62  ;;  %v2464_v2 = vunpack.i.h.bf16 %v2462_v5  ;;  %v2459_v4 = vunpack.i.h.bf16 %v2457_v62 }
 0xbd4   : > { %v1654_v14 = vsel %vm539_vm0, %v2458_v63, %v2463_v3  ;;  %v1655_v18 = vsel %vm539_vm0, %v2459_v4, %v2464_v2 }
 0xbd5   : > { %v2467_v7 = vpop.permute.xlu1 %2466  ;;  %v2472_v8 = vpop.permute.xlu0 %2471 }
 0xbd6   : > { %v2469_v9 = vunpack.i.h.bf16 %v2467_v7  ;;  %v2468_v10 = vunpack.i.l.bf16 %v2467_v7  ;;  %v2473_v13 = vunpack.i.l.bf16 %v2472_v8  ;;  %v2474_v15 = vunpack.i.h.bf16 %v2472_v8 }
 0xbd8   : > { %v1656_v16 = vsel %vm827_vm11, %v1654_v14, %v2468_v10  ;;  %v1650_v17 = vsel %vm1649_vm4, %v3400_v12, %v2473_v13  ;;  %v1657_v21 = vsel %vm827_vm11, %v1655_v18, %v2469_v9  ;;  %v1651_v25 = vsel %vm1649_vm4, %v3397_v11, %v2474_v15  ;;  %v1876_v11 = vld [vmem:[%s3519_s11] sm:$0xff] }
 0xbd9   : > { %v1632_v19 = vpop.permute.xlu1 %1631  ;;  %v1634_v20 = vpop.permute.xlu0 %1633  ;;  %v1652_v23 = vsel %vm594_vm6, %v1650_v17, %v2458_v63  ;;  %v1653_v29 = vsel %vm594_vm6, %v1651_v25, %v2459_v4 }
 0xbda   : > { %v1659_v22 = vsel %vm1658_vm10, %v1656_v16, %v1632_v19  ;;  %v1660_v24 = vsel %vm1658_vm10, %v1657_v21, %v1634_v20 }
 0xbdb   : > { %1776 = vmatprep.mubr.f32.mxu0 %v1659_v22 }
 0xbdc   : > { %1777 = vmatmul.mubr.f32.vlgmr.msra.gmra.mxu0 %v1652_v23 }
 0xbdd   : > { %v1644_v26 = vpop.permute.xlu1 %1643  ;;  %v1646_v27 = vpop.permute.xlu0 %1645  ;;  %1781 = vmatprep.mubr.f32.mxu0 %v1660_v24  ;;  %2330 = vmatpush3.msra.mxu0 %v1877_v30 }
 0xbde   : > { %v1661_v12 = vsel %vm741_vm8, %v1632_v19, %v1644_v26  ;;  %v1662_v28 = vsel %vm741_vm8, %v1634_v20, %v1646_v27  ;;  %2331 = vmatprep.subr.mxu0 %v1876_v11 }
 0xbdf   : > { %2326 = vmatprep.mubr.msk.f32.mxu1 %vm1702_vm13, %v1661_v12  ;;  %2332 = vmatpush3.msra.mxu0 %v1876_v11 }
 0xbe0   : > { %1782 = vmatmul.mubr.f32.gmra.mxu0 %v1653_v29  ;;  %2327 = vmatmul.mubr.msk.f32.vlgmr.msra.gmra.mxu1 %vm1702_vm13, %v1662_v28 }
 0xc9c   : > { %v2229_v31 = vpop.f32.mrf.mxu0 }
 0xc9e   : > { %v2230_v32 = vpop.f32.mrf.mxu0 }
 0xc9f   : > { %v2231_v35 = vadd.f32 %v2230_v32, %v2229_v31 }
 0xca0   : > { %v2232_v33 = vpop.f32.mrf.mxu0  ;;  %v2328_v34 = vpop.f32.mrf.mxu1 }
 0xca2   : > { %v2233_v0 = vpop.f32.mrf.mxu0  ;;  %v1853_v36 = vpop.f32.mrf.mxu1 }
 0xca3   : > { %v2234_v37 = vadd.f32 %v2233_v0, %v2232_v33  ;;  %v1854_v38 = vadd.f32 %v2231_v35, %v1853_v36 }
 0xca5   : > { %v1859_v39 = vadd.f32 %v2328_v34, %v2234_v37  ;;  %v2119_v40 = vclamps-f32 %v1854_v38, 30.0 }
 0xca7   : > { %v2120_v41 = vclamps-f32 %v1859_v39, 30.0  ;;  %v1866_v1 = vsub.f32 0.0, %v2119_v40 }
 0xca9   : > { %v1867_v42 = vsub.f32 0.0, %v2120_v41  ;;  %v1868_v43 = vmul.f32 1.442695, %v1866_v1 }
 0xcab   : > { %v1870_v44 = vmul.f32 1.442695, %v1867_v42  ;;  %2479 = vpow2.f32 %v1868_v43 }
 0xcad   : > { %2481 = vpow2.f32 %v1870_v44 }
 0xcb8   : > { %v2480_v45 = vpop.eup %2479 }
 0xcb9   : > { %v1872_v46 = vadd.f32 1.0, %v2480_v45 }
 0xcba   : > { %v2482_v47 = vpop.eup %2481 }
 0xcbb   : > { %v1873_v48 = vadd.f32 1.0, %v2482_v47  ;;  %2483 = vrcp.f32 %v1872_v46 }
 0xcbd   : > { %2485 = vrcp.f32 %v1873_v48 }
 0xcc8   : > { %v2484_v51 = vpop.eup %2483 }
 0xcc9   : > { %2333 = vmatprep.mubr.msk.f32.mxu0 %vm585_vm5, %v2484_v51 }
 0xcca   : > { %v2486_v52 = vpop.eup %2485 }
 0xccb   : > { %2334 = vmatmul.mubr.msk.f32.vlgmr.msra.gmra.mxu0 %vm585_vm5, %v2486_v52 }
 0xd8b   : > { %v2335_v56 = vpop.f32.mrf.mxu0 }
 0xd8c   : > { %v1960_v58 = vmul.f32 %v2335_v56, %v3275_v54 }
 0xd8d   : > { %v1950_v59 = vpop.f32.mrf.mxu0 }
 0xd8e   : > { %v1962_v61 = vadd.f32 %v1960_v58, %v1074_v57  ;;  %v1959_v6 = vmul.f32 %v1950_v59, %v3278_v55 }
 0xd90   : > { %v1964_v5 = vmax.f32 %v1962_v61, 0.0  ;;  %v1961_v62 = vadd.f32 %v1959_v6, %v1069_v60 }
 0xd92   : > { %1966 = vst [vmem:[%s500_s20 + $0x8] sm:$0xff] %v1964_v5  ;;  %v1963_v3 = vmax.f32 %v1961_v62, 0.0 }
 0xd94   : > { %1965 = vst [vmem:[%s500_s20] sm:$0xff] %v1963_v3 }
 0xd95 PF: > { %p25_p9 = scmp.ge.s32.totalorder %s2881_s16, 4   ;;  %s3550_s21 = smov %s2683_s22 }
 0xd96   : > { %s3551_s22 = smov %s2687_s23  ;;  %s3552_s23 = smov %s2892_s14 }
 0xd97   : > { %s3553_s24 = smov %s2881_s16  ;;  %27 = sbr.rel (!%p25_p9) target bundleno = 9 (0x9), region = 128 }
 0xd9c   :  { %1988 = vsyncpa [#allocation3], 1 }
 0xd9d   :  { %1990 = vsyncpa [#allocation3 + $0x1], 1 }
 0xd9e   :  { %1991 = vsyncpa [#allocation5], 1 }
 0xd9f   :  { %1992 = vsyncpa [#allocation8], 1 }
 0xda0   :  { %1993 = vsyncpa [#allocation11], 1 }

</bundles_post_ra>
